<compile_context>
chip_gen: v6e
topology: v6e:2x2x1
jax: 0.10.0
libtpu: 0.0.40
codegen_flags: <defaults>
</compile_context>

<pallas_src>
import functools

import jax
import jax.numpy as jnp
from jax.experimental import pallas as pl
from jax.experimental.pallas import tpu as pltpu

# ---------------- configuration (small synthetic shapes) -------------------
BATCH = 24                  # divisible by 3, sublane-aligned (3 x 8 rows)
TRIPLET = BATCH // 3        # 8  (sublane-aligned)
C_IN = 4
H = W = 16
N_MID = 1024
EMB = 128
N_CLASS = 99
N_CLASS_PAD = 128           # lane-dense padded class axis
N_CAND = 4
ALPHA = 0.1
BETA = 1.0
MARGIN = 1.0
BN_EPS = 1e-5
NEG_INF = -1e30             # padded-class bias -> exp() underflows to 0


def _vmem():
    return pl.BlockSpec(memory_space=pltpu.MemorySpace.VMEM)


def _smem():
    return pl.BlockSpec(memory_space=pltpu.MemorySpace.SMEM)


# ---------------------------------------------------------------------------
# In-kernel helpers (traced inside the Pallas kernel body).
# ---------------------------------------------------------------------------
def _log_softmax(logits):
    m = jnp.max(logits, axis=1, keepdims=True)
    z = logits - m
    return z - jnp.log(jnp.sum(jnp.exp(z), axis=1, keepdims=True))


def _nll_rows(logits, onehot):
    # per-row negative log likelihood, (rows, 1)
    return -jnp.sum(onehot * _log_softmax(logits), axis=1, keepdims=True)


def _triplet_loss(a, p, n):
    # squared-L2 triplet margin loss, mean over rows -> (1, 1)
    d_ap = jnp.sum((a - p) ** 2, axis=1, keepdims=True)
    d_an = jnp.sum((a - n) ** 2, axis=1, keepdims=True)
    per = jnp.maximum(d_ap - d_an + MARGIN, 0.0)
    return jnp.sum(per, axis=0, keepdims=True) * (1.0 / float(TRIPLET))


# ---------------------------------------------------------------------------
# Fused kernel: backbone stand-in + BN1d (batch stats) + fc1 + classifier +
# jclass + triplet jm + candidates + jcand + hardest pick + jsyn + jmetric.
# ---------------------------------------------------------------------------
def fused_kernel(coeff_ref,                       # SMEM (1,) f32
                 x_ref,                           # (B, C, H*W) f32
                 lab_ref,                         # (B, 1) int32
                 w0_ref, b0_ref,                  # (C, 1024), (1, 1024)
                 g_ref, be_ref,                   # BN affine, (1, 1024) each
                 w1_ref, b1_ref,                  # (1024, 128) bf16, (1, 128)
                 wc_ref, bc_ref,                  # (128, 128), (1, 128)
                 emb_ref,                         # out (B, 128) f32
                 scal_ref):                       # out (1, 128) f32
    # ---- backbone stand-in: GAP over spatial (lane) axis + Linear ----------
    x = x_ref[...]                                               # (B, C, HW)
    gap = jnp.sum(x, axis=-1) * (1.0 / float(H * W))             # (B, C)
    feats = jnp.dot(gap, w0_ref[...],
                    preferred_element_type=jnp.float32) + b0_ref[...]  # (B,1024)

    # ---- BatchNorm1d, training mode (biased batch statistics), f32 --------
    mu = jnp.mean(feats, axis=0, keepdims=True)
    xc = feats - mu
    var = jnp.mean(xc * xc, axis=0, keepdims=True)
    bn = xc * g_ref[...] * jax.lax.rsqrt(var + BN_EPS) + be_ref[...]

    # ---- fc1: 1024 -> 128 (bf16 operands, f32 accumulate) ------------------
    emb = jnp.dot(bn.astype(jnp.bfloat16), w1_ref[...],
                  preferred_element_type=jnp.float32) + b1_ref[...]    # (B,128)
    emb_ref[...] = emb.astype(emb_ref.dtype)

    # ---- one-hot targets built in-kernel (padded cols never match) ---------
    lab = lab_ref[...]                                            # (B, 1) i32
    cls_iota = jax.lax.broadcasted_iota(jnp.int32, (BATCH, N_CLASS_PAD), 1)
    onehot = (cls_iota == lab).astype(jnp.float32)                # (B, 128)

    # ---- classifier on full batch: jclass (mean NLL) ------------------------
    wc_b = wc_ref[...].astype(jnp.bfloat16)                       # reused 3x
    bc = bc_ref[...]
    logits_orig = jnp.dot(emb.astype(jnp.bfloat16), wc_b,
                          preferred_element_type=jnp.float32) + bc
    nll_all = _nll_rows(logits_orig, onehot)                      # (B, 1)
    jclass_v = jnp.sum(nll_all, axis=0, keepdims=True) * (1.0 / float(BATCH))

    # ---- chunk embedding into (anchor, positive, negative) -----------------
    anchor = emb[0 * TRIPLET:1 * TRIPLET]
    positive = emb[1 * TRIPLET:2 * TRIPLET]
    negative = emb[2 * TRIPLET:3 * TRIPLET]
    onehot_neg = onehot[2 * TRIPLET:3 * TRIPLET]                  # (T, 128)

    # ---- jm: triplet loss on original (a, p, n) -----------------------------
    jm = _triplet_loss(anchor, positive, negative)                # (1, 1)

    # ---- candidates: logits are affine in (negative, mid) -> 2 matmuls -----
    mid = (anchor + negative) * 0.5
    logits_n = jnp.dot(negative.astype(jnp.bfloat16), wc_b,
                       preferred_element_type=jnp.float32)        # no bias yet
    logits_m = jnp.dot(mid.astype(jnp.bfloat16), wc_b,
                       preferred_element_type=jnp.float32)

    total = float(N_CAND + 1)
    cand_list = [negative]
    logit_list = [logits_n + bc]
    for k in range(1, N_CAND + 1):
        wl = float(k) / total
        wr = (total - float(k)) / total
        cand_list.append(negative * wl + mid * wr)
        logit_list.append(logits_n * wl + logits_m * wr + bc)

    nll_list = [_nll_rows(lg, onehot_neg) for lg in logit_list]   # each (T, 1)

    loss_sum = nll_list[0]
    for k in range(1, len(nll_list)):
        loss_sum = loss_sum + nll_list[k]
    jcand_v = (jnp.sum(loss_sum, axis=0, keepdims=True)
               * (1.0 / (total * float(TRIPLET))))                # (1, 1)

    # ---- pickHardestSample: less = (loss <= alpha) * loss; argmax over cand.
    # First-occurrence ties (strict >) matches torch.argmax; if every loss is
    # above alpha, `less` is all zero and index 0 (raw negative) is selected,
    # matching the reference behavior.
    less = [jnp.where(l <= ALPHA, l, jnp.zeros_like(l)) for l in nll_list]
    best_val = less[0]
    best_idx = jnp.zeros((TRIPLET, 1), jnp.int32)
    for k in range(1, len(less)):
        upd = less[k] > best_val
        best_val = jnp.where(upd, less[k], best_val)
        best_idx = jnp.where(upd, jnp.int32(k), best_idx)

    hardest = cand_list[0]
    for k in range(1, len(cand_list)):
        hardest = jnp.where(best_idx == k, cand_list[k], hardest)  # (T, 128)

    # ---- jsyn: triplet loss on (anchor, positive, hardest) -----------------
    jsyn = _triplet_loss(anchor, positive, hardest)               # (1, 1)

    # ---- jmetric = coeff * jm + (1 - coeff) * jsyn --------------------------
    coeff = coeff_ref[0]
    jmetric = coeff * jm + (1.0 - coeff) * jsyn                   # (1, 1)

    # ---- pack the three scalars into one lane-dense (1, 128) output --------
    lane = jax.lax.broadcasted_iota(jnp.int32, (1, N_CLASS_PAD), 1)
    packed = (jnp.where(lane == 0, jmetric, 0.0)
              + jnp.where(lane == 1, jclass_v, 0.0)
              + jnp.where(lane == 2, jcand_v, 0.0))
    scal_ref[...] = packed.astype(scal_ref.dtype)


# ---------------------------------------------------------------------------
# Wrapper
# ---------------------------------------------------------------------------
@functools.partial(jax.jit, static_argnames=())
def triplet_cdml_forward(x, t, jclass_in, params):
    """Returns (jmetric, jclass, jcand, embedding_z) like TripletCDML.forward."""
    coeff = jnp.exp(-BETA / jclass_in).astype(jnp.float32).reshape(1)  # SMEM
    labels = t.reshape(BATCH, 1).astype(jnp.int32)
    x_flat = x.reshape(BATCH, C_IN, H * W)                       # NCHW -> (B,C,HW)

    emb_z, scalars = pl.pallas_call(
        fused_kernel,
        out_shape=(jax.ShapeDtypeStruct((BATCH, EMB), jnp.float32),
                   jax.ShapeDtypeStruct((1, N_CLASS_PAD), jnp.float32)),
        in_specs=[_smem()] + [_vmem()] * 10,
        out_specs=(_vmem(), _vmem()),
    )(coeff, x_flat, labels,
      params["w0"], params["b0"], params["gamma"], params["beta"],
      params["w1"], params["b1"], params["wc"], params["bc"])

    jmetric = scalars[0, 0]
    jclass = scalars[0, 1]
    jcand = scalars[0, 2]
    return jmetric, jclass, jcand, emb_z


def init_params(key):
    ks = jax.random.split(key, 6)
    # classifier padded 99 -> 128: extra columns are zero weight / -1e30 bias
    wc_real = 0.05 * jax.random.normal(ks[4], (EMB, N_CLASS), jnp.float32)
    wc = jnp.zeros((EMB, N_CLASS_PAD), jnp.float32).at[:, :N_CLASS].set(wc_real)
    bc_real = 0.05 * jax.random.normal(ks[5], (1, N_CLASS), jnp.float32)
    bc = jnp.full((1, N_CLASS_PAD), NEG_INF, jnp.float32).at[:, :N_CLASS].set(bc_real)
    return {
        # backbone stand-in: Linear(C_IN -> N_MID) after GAP
        "w0": 0.1 * jax.random.normal(ks[0], (C_IN, N_MID), jnp.float32),
        "b0": 0.1 * jax.random.normal(ks[1], (1, N_MID), jnp.float32),
        # BatchNorm1d(N_MID) affine params (fresh init)
        "gamma": jnp.ones((1, N_MID), jnp.float32),
        "beta": jnp.zeros((1, N_MID), jnp.float32),
        # fc1: Linear(N_MID -> EMB); stored bf16 (MXU-native operand, f32 acc)
        "w1": (0.05 * jax.random.normal(ks[2], (N_MID, EMB), jnp.float32)
               ).astype(jnp.bfloat16),
        "b1": 0.05 * jax.random.normal(ks[3], (1, EMB), jnp.float32),
        # softmax_classifier: Linear(EMB -> N_CLASS), lane-padded to 128
        "wc": wc,
        "bc": bc,
    }


if __name__ == "__main__":
    key = jax.random.PRNGKey(0)
    k_x, k_t, k_p = jax.random.split(key, 3)

    x = jax.random.normal(k_x, (BATCH, C_IN, H, W), jnp.float32)       # NCHW
    t = jax.random.randint(k_t, (BATCH, 1), 0, N_CLASS, jnp.int32)     # labels
    jclass_in = jnp.float32(2.0)                                       # scalar arg
    params = init_params(k_p)

    jmetric, jclass, jcand, emb_z = triplet_cdml_forward(x, t, jclass_in, params)
    jax.block_until_ready((jmetric, jclass, jcand, emb_z))

    assert emb_z.shape == (BATCH, EMB)
    assert bool(jnp.isfinite(jmetric))
    assert bool(jnp.isfinite(jclass))
    assert bool(jnp.isfinite(jcand))
    print("KERNEL_OK")
</pallas_src>

<mosaic_0001>
module attributes {stable_mosaic.version = 11 : i64} {
  func.func @fused_kernel(%arg0: memref<1xf32, #tpu.memory_space<smem>>, %arg1: memref<24x4x256xf32, #tpu.memory_space<vmem>>, %arg2: memref<24x1xi32, #tpu.memory_space<vmem>>, %arg3: memref<4x1024xf32, #tpu.memory_space<vmem>>, %arg4: memref<1x1024xf32, #tpu.memory_space<vmem>>, %arg5: memref<1x1024xf32, #tpu.memory_space<vmem>>, %arg6: memref<1x1024xf32, #tpu.memory_space<vmem>>, %arg7: memref<1024x128xbf16, #tpu.memory_space<vmem>>, %arg8: memref<1x128xf32, #tpu.memory_space<vmem>>, %arg9: memref<128x128xf32, #tpu.memory_space<vmem>>, %arg10: memref<1x128xf32, #tpu.memory_space<vmem>>, %arg11: memref<24x128xf32, #tpu.memory_space<vmem>>, %arg12: memref<1x128xf32, #tpu.memory_space<vmem>>) attributes {dimension_semantics = [], scalar_prefetch = 0 : i64, scratch_operands = 0 : i64, tpu.core_type = #tpu.core_type<tc>} {
    %c0 = arith.constant 0 : index
    %c0_0 = arith.constant 0 : index
    %c0_1 = arith.constant 0 : index
    %0 = vector.load %arg1[%c0, %c0_0, %c0_1] : memref<24x4x256xf32, #tpu.memory_space<vmem>>, vector<24x4x256xf32>
    %cst = arith.constant dense<0.000000e+00> : vector<24x4xf32>
    %1 = vector.multi_reduction <add>, %0, %cst [2] : vector<24x4x256xf32> to vector<24x4xf32>
    %cst_2 = arith.constant 3.906250e-03 : f32
    %2 = vector.broadcast %cst_2 : f32 to vector<24x4xf32>
    %3 = arith.mulf %1, %2 : vector<24x4xf32>
    %c0_3 = arith.constant 0 : index
    %c0_4 = arith.constant 0 : index
    %4 = vector.load %arg3[%c0_3, %c0_4] : memref<4x1024xf32, #tpu.memory_space<vmem>>, vector<4x1024xf32>
    %cst_5 = arith.constant dense<0.000000e+00> : vector<24x1024xf32>
    %5 = tpu.matmul %3, %4, %cst_5 {dimension_numbers = #tpu.dot_dimension_numbers<[1], [0], [0], [1], [0, 0, 1, 1], [], []>} : vector<24x4xf32>, vector<4x1024xf32>, vector<24x1024xf32> -> vector<24x1024xf32>
    %c0_6 = arith.constant 0 : index
    %c0_7 = arith.constant 0 : index
    %6 = vector.load %arg4[%c0_6, %c0_7] : memref<1x1024xf32, #tpu.memory_space<vmem>>, vector<1x1024xf32>
    %7 = vector.broadcast %6 : vector<1x1024xf32> to vector<24x1024xf32>
    %8 = arith.addf %5, %7 : vector<24x1024xf32>
    %cst_8 = arith.constant dense<0.000000e+00> : vector<1024xf32>
    %9 = vector.multi_reduction <add>, %8, %cst_8 [0] : vector<24x1024xf32> to vector<1024xf32>
    %10 = vector.shape_cast %9 : vector<1024xf32> to vector<1x1024xf32>
    %cst_9 = arith.constant 2.400000e+01 : f32
    %11 = vector.broadcast %cst_9 : f32 to vector<1x1024xf32>
    %12 = arith.divf %10, %11 : vector<1x1024xf32>
    %13 = vector.broadcast %12 : vector<1x1024xf32> to vector<24x1024xf32>
    %14 = arith.subf %8, %13 : vector<24x1024xf32>
    %15 = arith.mulf %14, %14 : vector<24x1024xf32>
    %cst_10 = arith.constant dense<0.000000e+00> : vector<1024xf32>
    %16 = vector.multi_reduction <add>, %15, %cst_10 [0] : vector<24x1024xf32> to vector<1024xf32>
    %17 = vector.shape_cast %16 : vector<1024xf32> to vector<1x1024xf32>
    %cst_11 = arith.constant 2.400000e+01 : f32
    %18 = vector.broadcast %cst_11 : f32 to vector<1x1024xf32>
    %19 = arith.divf %17, %18 : vector<1x1024xf32>
    %c0_12 = arith.constant 0 : index
    %c0_13 = arith.constant 0 : index
    %20 = vector.load %arg5[%c0_12, %c0_13] : memref<1x1024xf32, #tpu.memory_space<vmem>>, vector<1x1024xf32>
    %21 = vector.broadcast %20 : vector<1x1024xf32> to vector<24x1024xf32>
    %22 = arith.mulf %14, %21 : vector<24x1024xf32>
    %cst_14 = arith.constant 9.99999974E-6 : f32
    %23 = vector.broadcast %cst_14 : f32 to vector<1x1024xf32>
    %24 = arith.addf %19, %23 : vector<1x1024xf32>
    %25 = math.rsqrt %24 : vector<1x1024xf32>
    %26 = vector.broadcast %25 : vector<1x1024xf32> to vector<24x1024xf32>
    %27 = arith.mulf %22, %26 : vector<24x1024xf32>
    %c0_15 = arith.constant 0 : index
    %c0_16 = arith.constant 0 : index
    %28 = vector.load %arg6[%c0_15, %c0_16] : memref<1x1024xf32, #tpu.memory_space<vmem>>, vector<1x1024xf32>
    %29 = vector.broadcast %28 : vector<1x1024xf32> to vector<24x1024xf32>
    %30 = arith.addf %27, %29 : vector<24x1024xf32>
    %31 = arith.truncf %30 : vector<24x1024xf32> to vector<24x1024xbf16>
    %c0_17 = arith.constant 0 : index
    %c0_18 = arith.constant 0 : index
    %32 = vector.load %arg7[%c0_17, %c0_18] : memref<1024x128xbf16, #tpu.memory_space<vmem>>, vector<1024x128xbf16>
    %cst_19 = arith.constant dense<0.000000e+00> : vector<24x128xf32>
    %33 = tpu.matmul %31, %32, %cst_19 {dimension_numbers = #tpu.dot_dimension_numbers<[1], [0], [0], [1], [0, 0, 1, 1], [], []>} : vector<24x1024xbf16>, vector<1024x128xbf16>, vector<24x128xf32> -> vector<24x128xf32>
    %c0_20 = arith.constant 0 : index
    %c0_21 = arith.constant 0 : index
    %34 = vector.load %arg8[%c0_20, %c0_21] : memref<1x128xf32, #tpu.memory_space<vmem>>, vector<1x128xf32>
    %35 = vector.broadcast %34 : vector<1x128xf32> to vector<24x128xf32>
    %36 = arith.addf %33, %35 : vector<24x128xf32>
    %c0_22 = arith.constant 0 : index
    %c0_23 = arith.constant 0 : index
    %37 = vector.load %arg11[%c0_22, %c0_23] : memref<24x128xf32, #tpu.memory_space<vmem>>, vector<24x128xf32>
    tpu.vector_store %arg11[%c0_22, %c0_23], %36 {strides = array<i32>} : memref<24x128xf32, #tpu.memory_space<vmem>>, vector<24x128xf32>,
    %c0_24 = arith.constant 0 : index
    %c0_25 = arith.constant 0 : index
    %38 = vector.load %arg2[%c0_24, %c0_25] : memref<24x1xi32, #tpu.memory_space<vmem>>, vector<24x1xi32>
    %39 = tpu.iota {dimensions = array<i32: 1>} : vector<24x128xi32>
    %40 = vector.broadcast %38 : vector<24x1xi32> to vector<24x128xi32>
    %41 = arith.cmpi eq, %39, %40 : vector<24x128xi32>
    %42 = arith.extui %41 : vector<24x128xi1> to vector<24x128xi32>
    %43 = arith.sitofp %42 : vector<24x128xi32> to vector<24x128xf32>
    %c0_26 = arith.constant 0 : index
    %c0_27 = arith.constant 0 : index
    %44 = vector.load %arg9[%c0_26, %c0_27] : memref<128x128xf32, #tpu.memory_space<vmem>>, vector<128x128xf32>
    %45 = arith.truncf %44 : vector<128x128xf32> to vector<128x128xbf16>
    %c0_28 = arith.constant 0 : index
    %c0_29 = arith.constant 0 : index
    %46 = vector.load %arg10[%c0_28, %c0_29] : memref<1x128xf32, #tpu.memory_space<vmem>>, vector<1x128xf32>
    %47 = arith.truncf %36 : vector<24x128xf32> to vector<24x128xbf16>
    %cst_30 = arith.constant dense<0.000000e+00> : vector<24x128xf32>
    %48 = tpu.matmul %47, %45, %cst_30 {dimension_numbers = #tpu.dot_dimension_numbers<[1], [0], [0], [1], [0, 0, 1, 1], [], []>} : vector<24x128xbf16>, vector<128x128xbf16>, vector<24x128xf32> -> vector<24x128xf32>
    %49 = vector.broadcast %46 : vector<1x128xf32> to vector<24x128xf32>
    %50 = arith.addf %48, %49 : vector<24x128xf32>
    %cst_31 = arith.constant dense<0xFF800000> : vector<24xf32>
    %51 = vector.multi_reduction <maximumf>, %50, %cst_31 [1] : vector<24x128xf32> to vector<24xf32>
    %52 = vector.shape_cast %51 : vector<24xf32> to vector<24x1xf32>
    %53 = vector.broadcast %52 : vector<24x1xf32> to vector<24x128xf32>
    %54 = arith.subf %50, %53 : vector<24x128xf32>
    %55 = math.exp %54 : vector<24x128xf32>
    %cst_32 = arith.constant dense<0.000000e+00> : vector<24xf32>
    %56 = vector.multi_reduction <add>, %55, %cst_32 [1] : vector<24x128xf32> to vector<24xf32>
    %57 = vector.shape_cast %56 : vector<24xf32> to vector<24x1xf32>
    %58 = math.log %57 : vector<24x1xf32>
    %59 = vector.broadcast %58 : vector<24x1xf32> to vector<24x128xf32>
    %60 = arith.subf %54, %59 : vector<24x128xf32>
    %61 = arith.mulf %43, %60 : vector<24x128xf32>
    %cst_33 = arith.constant dense<0.000000e+00> : vector<24xf32>
    %62 = vector.multi_reduction <add>, %61, %cst_33 [1] : vector<24x128xf32> to vector<24xf32>
    %63 = vector.shape_cast %62 : vector<24xf32> to vector<24x1xf32>
    %cst_34 = arith.constant 0.000000e+00 : f32
    %64 = vector.broadcast %cst_34 : f32 to vector<24x1xf32>
    %65 = arith.subf %64, %63 : vector<24x1xf32>
    %cst_35 = arith.constant dense<0.000000e+00> : vector<1xf32>
    %66 = vector.multi_reduction <add>, %65, %cst_35 [0] : vector<24x1xf32> to vector<1xf32>
    %67 = vector.shape_cast %66 : vector<1xf32> to vector<1x1xf32>
    %cst_36 = arith.constant 0.0416666679 : f32
    %68 = vector.broadcast %cst_36 : f32 to vector<1x1xf32>
    %69 = arith.mulf %67, %68 : vector<1x1xf32>
    %70 = vector.extract_strided_slice %36 {offsets = [0, 0], sizes = [8, 128], strides = [1, 1]} : vector<24x128xf32> to vector<8x128xf32>
    %71 = vector.extract_strided_slice %36 {offsets = [8, 0], sizes = [8, 128], strides = [1, 1]} : vector<24x128xf32> to vector<8x128xf32>
    %72 = vector.extract_strided_slice %36 {offsets = [16, 0], sizes = [8, 128], strides = [1, 1]} : vector<24x128xf32> to vector<8x128xf32>
    %73 = vector.extract_strided_slice %43 {offsets = [16, 0], sizes = [8, 128], strides = [1, 1]} : vector<24x128xf32> to vector<8x128xf32>
    %74 = arith.subf %70, %71 : vector<8x128xf32>
    %75 = arith.mulf %74, %74 : vector<8x128xf32>
    %cst_37 = arith.constant dense<0.000000e+00> : vector<8xf32>
    %76 = vector.multi_reduction <add>, %75, %cst_37 [1] : vector<8x128xf32> to vector<8xf32>
    %77 = vector.shape_cast %76 : vector<8xf32> to vector<8x1xf32>
    %78 = arith.subf %70, %72 : vector<8x128xf32>
    %79 = arith.mulf %78, %78 : vector<8x128xf32>
    %cst_38 = arith.constant dense<0.000000e+00> : vector<8xf32>
    %80 = vector.multi_reduction <add>, %79, %cst_38 [1] : vector<8x128xf32> to vector<8xf32>
    %81 = vector.shape_cast %80 : vector<8xf32> to vector<8x1xf32>
    %82 = arith.subf %77, %81 : vector<8x1xf32>
    %cst_39 = arith.constant 1.000000e+00 : f32
    %83 = vector.broadcast %cst_39 : f32 to vector<8x1xf32>
    %84 = arith.addf %82, %83 : vector<8x1xf32>
    %cst_40 = arith.constant 0.000000e+00 : f32
    %85 = vector.broadcast %cst_40 : f32 to vector<8x1xf32>
    %86 = arith.maximumf %84, %85 : vector<8x1xf32>
    %cst_41 = arith.constant dense<0.000000e+00> : vector<1xf32>
    %87 = vector.multi_reduction <add>, %86, %cst_41 [0] : vector<8x1xf32> to vector<1xf32>
    %88 = vector.shape_cast %87 : vector<1xf32> to vector<1x1xf32>
    %cst_42 = arith.constant 1.250000e-01 : f32
    %89 = vector.broadcast %cst_42 : f32 to vector<1x1xf32>
    %90 = arith.mulf %88, %89 : vector<1x1xf32>
    %91 = arith.addf %70, %72 : vector<8x128xf32>
    %cst_43 = arith.constant 5.000000e-01 : f32
    %92 = vector.broadcast %cst_43 : f32 to vector<8x128xf32>
    %93 = arith.mulf %91, %92 : vector<8x128xf32>
    %94 = arith.truncf %72 : vector<8x128xf32> to vector<8x128xbf16>
    %cst_44 = arith.constant dense<0.000000e+00> : vector<8x128xf32>
    %95 = tpu.matmul %94, %45, %cst_44 {dimension_numbers = #tpu.dot_dimension_numbers<[1], [0], [0], [1], [0, 0, 1, 1], [], []>} : vector<8x128xbf16>, vector<128x128xbf16>, vector<8x128xf32> -> vector<8x128xf32>
    %96 = arith.truncf %93 : vector<8x128xf32> to vector<8x128xbf16>
    %cst_45 = arith.constant dense<0.000000e+00> : vector<8x128xf32>
    %97 = tpu.matmul %96, %45, %cst_45 {dimension_numbers = #tpu.dot_dimension_numbers<[1], [0], [0], [1], [0, 0, 1, 1], [], []>} : vector<8x128xbf16>, vector<128x128xbf16>, vector<8x128xf32> -> vector<8x128xf32>
    %98 = vector.broadcast %46 : vector<1x128xf32> to vector<8x128xf32>
    %99 = arith.addf %95, %98 : vector<8x128xf32>
    %cst_46 = arith.constant 2.000000e-01 : f32
    %100 = vector.broadcast %cst_46 : f32 to vector<8x128xf32>
    %101 = arith.mulf %72, %100 : vector<8x128xf32>
    %cst_47 = arith.constant 8.000000e-01 : f32
    %102 = vector.broadcast %cst_47 : f32 to vector<8x128xf32>
    %103 = arith.mulf %93, %102 : vector<8x128xf32>
    %104 = arith.addf %101, %103 : vector<8x128xf32>
    %cst_48 = arith.constant 2.000000e-01 : f32
    %105 = vector.broadcast %cst_48 : f32 to vector<8x128xf32>
    %106 = arith.mulf %95, %105 : vector<8x128xf32>
    %cst_49 = arith.constant 8.000000e-01 : f32
    %107 = vector.broadcast %cst_49 : f32 to vector<8x128xf32>
    %108 = arith.mulf %97, %107 : vector<8x128xf32>
    %109 = arith.addf %106, %108 : vector<8x128xf32>
    %110 = vector.broadcast %46 : vector<1x128xf32> to vector<8x128xf32>
    %111 = arith.addf %109, %110 : vector<8x128xf32>
    %cst_50 = arith.constant 4.000000e-01 : f32
    %112 = vector.broadcast %cst_50 : f32 to vector<8x128xf32>
    %113 = arith.mulf %72, %112 : vector<8x128xf32>
    %cst_51 = arith.constant 6.000000e-01 : f32
    %114 = vector.broadcast %cst_51 : f32 to vector<8x128xf32>
    %115 = arith.mulf %93, %114 : vector<8x128xf32>
    %116 = arith.addf %113, %115 : vector<8x128xf32>
    %cst_52 = arith.constant 4.000000e-01 : f32
    %117 = vector.broadcast %cst_52 : f32 to vector<8x128xf32>
    %118 = arith.mulf %95, %117 : vector<8x128xf32>
    %cst_53 = arith.constant 6.000000e-01 : f32
    %119 = vector.broadcast %cst_53 : f32 to vector<8x128xf32>
    %120 = arith.mulf %97, %119 : vector<8x128xf32>
    %121 = arith.addf %118, %120 : vector<8x128xf32>
    %122 = vector.broadcast %46 : vector<1x128xf32> to vector<8x128xf32>
    %123 = arith.addf %121, %122 : vector<8x128xf32>
    %cst_54 = arith.constant 6.000000e-01 : f32
    %124 = vector.broadcast %cst_54 : f32 to vector<8x128xf32>
    %125 = arith.mulf %72, %124 : vector<8x128xf32>
    %cst_55 = arith.constant 4.000000e-01 : f32
    %126 = vector.broadcast %cst_55 : f32 to vector<8x128xf32>
    %127 = arith.mulf %93, %126 : vector<8x128xf32>
    %128 = arith.addf %125, %127 : vector<8x128xf32>
    %cst_56 = arith.constant 6.000000e-01 : f32
    %129 = vector.broadcast %cst_56 : f32 to vector<8x128xf32>
    %130 = arith.mulf %95, %129 : vector<8x128xf32>
    %cst_57 = arith.constant 4.000000e-01 : f32
    %131 = vector.broadcast %cst_57 : f32 to vector<8x128xf32>
    %132 = arith.mulf %97, %131 : vector<8x128xf32>
    %133 = arith.addf %130, %132 : vector<8x128xf32>
    %134 = vector.broadcast %46 : vector<1x128xf32> to vector<8x128xf32>
    %135 = arith.addf %133, %134 : vector<8x128xf32>
    %cst_58 = arith.constant 8.000000e-01 : f32
    %136 = vector.broadcast %cst_58 : f32 to vector<8x128xf32>
    %137 = arith.mulf %72, %136 : vector<8x128xf32>
    %cst_59 = arith.constant 2.000000e-01 : f32
    %138 = vector.broadcast %cst_59 : f32 to vector<8x128xf32>
    %139 = arith.mulf %93, %138 : vector<8x128xf32>
    %140 = arith.addf %137, %139 : vector<8x128xf32>
    %cst_60 = arith.constant 8.000000e-01 : f32
    %141 = vector.broadcast %cst_60 : f32 to vector<8x128xf32>
    %142 = arith.mulf %95, %141 : vector<8x128xf32>
    %cst_61 = arith.constant 2.000000e-01 : f32
    %143 = vector.broadcast %cst_61 : f32 to vector<8x128xf32>
    %144 = arith.mulf %97, %143 : vector<8x128xf32>
    %145 = arith.addf %142, %144 : vector<8x128xf32>
    %146 = vector.broadcast %46 : vector<1x128xf32> to vector<8x128xf32>
    %147 = arith.addf %145, %146 : vector<8x128xf32>
    %cst_62 = arith.constant dense<0xFF800000> : vector<8xf32>
    %148 = vector.multi_reduction <maximumf>, %99, %cst_62 [1] : vector<8x128xf32> to vector<8xf32>
    %149 = vector.shape_cast %148 : vector<8xf32> to vector<8x1xf32>
    %150 = vector.broadcast %149 : vector<8x1xf32> to vector<8x128xf32>
    %151 = arith.subf %99, %150 : vector<8x128xf32>
    %152 = math.exp %151 : vector<8x128xf32>
    %cst_63 = arith.constant dense<0.000000e+00> : vector<8xf32>
    %153 = vector.multi_reduction <add>, %152, %cst_63 [1] : vector<8x128xf32> to vector<8xf32>
    %154 = vector.shape_cast %153 : vector<8xf32> to vector<8x1xf32>
    %155 = math.log %154 : vector<8x1xf32>
    %156 = vector.broadcast %155 : vector<8x1xf32> to vector<8x128xf32>
    %157 = arith.subf %151, %156 : vector<8x128xf32>
    %158 = arith.mulf %73, %157 : vector<8x128xf32>
    %cst_64 = arith.constant dense<0.000000e+00> : vector<8xf32>
    %159 = vector.multi_reduction <add>, %158, %cst_64 [1] : vector<8x128xf32> to vector<8xf32>
    %160 = vector.shape_cast %159 : vector<8xf32> to vector<8x1xf32>
    %cst_65 = arith.constant 0.000000e+00 : f32
    %161 = vector.broadcast %cst_65 : f32 to vector<8x1xf32>
    %162 = arith.subf %161, %160 : vector<8x1xf32>
    %cst_66 = arith.constant dense<0xFF800000> : vector<8xf32>
    %163 = vector.multi_reduction <maximumf>, %111, %cst_66 [1] : vector<8x128xf32> to vector<8xf32>
    %164 = vector.shape_cast %163 : vector<8xf32> to vector<8x1xf32>
    %165 = vector.broadcast %164 : vector<8x1xf32> to vector<8x128xf32>
    %166 = arith.subf %111, %165 : vector<8x128xf32>
    %167 = math.exp %166 : vector<8x128xf32>
    %cst_67 = arith.constant dense<0.000000e+00> : vector<8xf32>
    %168 = vector.multi_reduction <add>, %167, %cst_67 [1] : vector<8x128xf32> to vector<8xf32>
    %169 = vector.shape_cast %168 : vector<8xf32> to vector<8x1xf32>
    %170 = math.log %169 : vector<8x1xf32>
    %171 = vector.broadcast %170 : vector<8x1xf32> to vector<8x128xf32>
    %172 = arith.subf %166, %171 : vector<8x128xf32>
    %173 = arith.mulf %73, %172 : vector<8x128xf32>
    %cst_68 = arith.constant dense<0.000000e+00> : vector<8xf32>
    %174 = vector.multi_reduction <add>, %173, %cst_68 [1] : vector<8x128xf32> to vector<8xf32>
    %175 = vector.shape_cast %174 : vector<8xf32> to vector<8x1xf32>
    %cst_69 = arith.constant 0.000000e+00 : f32
    %176 = vector.broadcast %cst_69 : f32 to vector<8x1xf32>
    %177 = arith.subf %176, %175 : vector<8x1xf32>
    %cst_70 = arith.constant dense<0xFF800000> : vector<8xf32>
    %178 = vector.multi_reduction <maximumf>, %123, %cst_70 [1] : vector<8x128xf32> to vector<8xf32>
    %179 = vector.shape_cast %178 : vector<8xf32> to vector<8x1xf32>
    %180 = vector.broadcast %179 : vector<8x1xf32> to vector<8x128xf32>
    %181 = arith.subf %123, %180 : vector<8x128xf32>
    %182 = math.exp %181 : vector<8x128xf32>
    %cst_71 = arith.constant dense<0.000000e+00> : vector<8xf32>
    %183 = vector.multi_reduction <add>, %182, %cst_71 [1] : vector<8x128xf32> to vector<8xf32>
    %184 = vector.shape_cast %183 : vector<8xf32> to vector<8x1xf32>
    %185 = math.log %184 : vector<8x1xf32>
    %186 = vector.broadcast %185 : vector<8x1xf32> to vector<8x128xf32>
    %187 = arith.subf %181, %186 : vector<8x128xf32>
    %188 = arith.mulf %73, %187 : vector<8x128xf32>
    %cst_72 = arith.constant dense<0.000000e+00> : vector<8xf32>
    %189 = vector.multi_reduction <add>, %188, %cst_72 [1] : vector<8x128xf32> to vector<8xf32>
    %190 = vector.shape_cast %189 : vector<8xf32> to vector<8x1xf32>
    %cst_73 = arith.constant 0.000000e+00 : f32
    %191 = vector.broadcast %cst_73 : f32 to vector<8x1xf32>
    %192 = arith.subf %191, %190 : vector<8x1xf32>
    %cst_74 = arith.constant dense<0xFF800000> : vector<8xf32>
    %193 = vector.multi_reduction <maximumf>, %135, %cst_74 [1] : vector<8x128xf32> to vector<8xf32>
    %194 = vector.shape_cast %193 : vector<8xf32> to vector<8x1xf32>
    %195 = vector.broadcast %194 : vector<8x1xf32> to vector<8x128xf32>
    %196 = arith.subf %135, %195 : vector<8x128xf32>
    %197 = math.exp %196 : vector<8x128xf32>
    %cst_75 = arith.constant dense<0.000000e+00> : vector<8xf32>
    %198 = vector.multi_reduction <add>, %197, %cst_75 [1] : vector<8x128xf32> to vector<8xf32>
    %199 = vector.shape_cast %198 : vector<8xf32> to vector<8x1xf32>
    %200 = math.log %199 : vector<8x1xf32>
    %201 = vector.broadcast %200 : vector<8x1xf32> to vector<8x128xf32>
    %202 = arith.subf %196, %201 : vector<8x128xf32>
    %203 = arith.mulf %73, %202 : vector<8x128xf32>
    %cst_76 = arith.constant dense<0.000000e+00> : vector<8xf32>
    %204 = vector.multi_reduction <add>, %203, %cst_76 [1] : vector<8x128xf32> to vector<8xf32>
    %205 = vector.shape_cast %204 : vector<8xf32> to vector<8x1xf32>
    %cst_77 = arith.constant 0.000000e+00 : f32
    %206 = vector.broadcast %cst_77 : f32 to vector<8x1xf32>
    %207 = arith.subf %206, %205 : vector<8x1xf32>
    %cst_78 = arith.constant dense<0xFF800000> : vector<8xf32>
    %208 = vector.multi_reduction <maximumf>, %147, %cst_78 [1] : vector<8x128xf32> to vector<8xf32>
    %209 = vector.shape_cast %208 : vector<8xf32> to vector<8x1xf32>
    %210 = vector.broadcast %209 : vector<8x1xf32> to vector<8x128xf32>
    %211 = arith.subf %147, %210 : vector<8x128xf32>
    %212 = math.exp %211 : vector<8x128xf32>
    %cst_79 = arith.constant dense<0.000000e+00> : vector<8xf32>
    %213 = vector.multi_reduction <add>, %212, %cst_79 [1] : vector<8x128xf32> to vector<8xf32>
    %214 = vector.shape_cast %213 : vector<8xf32> to vector<8x1xf32>
    %215 = math.log %214 : vector<8x1xf32>
    %216 = vector.broadcast %215 : vector<8x1xf32> to vector<8x128xf32>
    %217 = arith.subf %211, %216 : vector<8x128xf32>
    %218 = arith.mulf %73, %217 : vector<8x128xf32>
    %cst_80 = arith.constant dense<0.000000e+00> : vector<8xf32>
    %219 = vector.multi_reduction <add>, %218, %cst_80 [1] : vector<8x128xf32> to vector<8xf32>
    %220 = vector.shape_cast %219 : vector<8xf32> to vector<8x1xf32>
    %cst_81 = arith.constant 0.000000e+00 : f32
    %221 = vector.broadcast %cst_81 : f32 to vector<8x1xf32>
    %222 = arith.subf %221, %220 : vector<8x1xf32>
    %223 = arith.addf %162, %177 : vector<8x1xf32>
    %224 = arith.addf %223, %192 : vector<8x1xf32>
    %225 = arith.addf %224, %207 : vector<8x1xf32>
    %226 = arith.addf %225, %222 : vector<8x1xf32>
    %cst_82 = arith.constant dense<0.000000e+00> : vector<1xf32>
    %227 = vector.multi_reduction <add>, %226, %cst_82 [0] : vector<8x1xf32> to vector<1xf32>
    %228 = vector.shape_cast %227 : vector<1xf32> to vector<1x1xf32>
    %cst_83 = arith.constant 2.500000e-02 : f32
    %229 = vector.broadcast %cst_83 : f32 to vector<1x1xf32>
    %230 = arith.mulf %228, %229 : vector<1x1xf32>
    %cst_84 = arith.constant 1.000000e-01 : f32
    %231 = vector.broadcast %cst_84 : f32 to vector<8x1xf32>
    %232 = arith.cmpf ole, %162, %231 : vector<8x1xf32>
    %cst_85 = arith.constant 0.000000e+00 : f32
    %233 = vector.broadcast %cst_85 : f32 to vector<8x1xf32>
    %234 = arith.select %232, %162, %233 : vector<8x1xi1>, vector<8x1xf32>
    %cst_86 = arith.constant 1.000000e-01 : f32
    %235 = vector.broadcast %cst_86 : f32 to vector<8x1xf32>
    %236 = arith.cmpf ole, %177, %235 : vector<8x1xf32>
    %cst_87 = arith.constant 0.000000e+00 : f32
    %237 = vector.broadcast %cst_87 : f32 to vector<8x1xf32>
    %238 = arith.select %236, %177, %237 : vector<8x1xi1>, vector<8x1xf32>
    %cst_88 = arith.constant 1.000000e-01 : f32
    %239 = vector.broadcast %cst_88 : f32 to vector<8x1xf32>
    %240 = arith.cmpf ole, %192, %239 : vector<8x1xf32>
    %cst_89 = arith.constant 0.000000e+00 : f32
    %241 = vector.broadcast %cst_89 : f32 to vector<8x1xf32>
    %242 = arith.select %240, %192, %241 : vector<8x1xi1>, vector<8x1xf32>
    %cst_90 = arith.constant 1.000000e-01 : f32
    %243 = vector.broadcast %cst_90 : f32 to vector<8x1xf32>
    %244 = arith.cmpf ole, %207, %243 : vector<8x1xf32>
    %cst_91 = arith.constant 0.000000e+00 : f32
    %245 = vector.broadcast %cst_91 : f32 to vector<8x1xf32>
    %246 = arith.select %244, %207, %245 : vector<8x1xi1>, vector<8x1xf32>
    %cst_92 = arith.constant 1.000000e-01 : f32
    %247 = vector.broadcast %cst_92 : f32 to vector<8x1xf32>
    %248 = arith.cmpf ole, %222, %247 : vector<8x1xf32>
    %cst_93 = arith.constant 0.000000e+00 : f32
    %249 = vector.broadcast %cst_93 : f32 to vector<8x1xf32>
    %250 = arith.select %248, %222, %249 : vector<8x1xi1>, vector<8x1xf32>
    %c0_i32 = arith.constant 0 : i32
    %251 = vector.broadcast %c0_i32 : i32 to vector<8x1xi32>
    %252 = arith.cmpf ogt, %238, %234 : vector<8x1xf32>
    %253 = arith.select %252, %238, %234 : vector<8x1xi1>, vector<8x1xf32>
    %c1_i32 = arith.constant 1 : i32
    %254 = vector.broadcast %c1_i32 : i32 to vector<8x1xi32>
    %255 = arith.select %252, %254, %251 : vector<8x1xi1>, vector<8x1xi32>
    %256 = arith.cmpf ogt, %242, %253 : vector<8x1xf32>
    %257 = arith.select %256, %242, %253 : vector<8x1xi1>, vector<8x1xf32>
    %c2_i32 = arith.constant 2 : i32
    %258 = vector.broadcast %c2_i32 : i32 to vector<8x1xi32>
    %259 = arith.select %256, %258, %255 : vector<8x1xi1>, vector<8x1xi32>
    %260 = arith.cmpf ogt, %246, %257 : vector<8x1xf32>
    %261 = arith.select %260, %246, %257 : vector<8x1xi1>, vector<8x1xf32>
    %c3_i32 = arith.constant 3 : i32
    %262 = vector.broadcast %c3_i32 : i32 to vector<8x1xi32>
    %263 = arith.select %260, %262, %259 : vector<8x1xi1>, vector<8x1xi32>
    %264 = arith.cmpf ogt, %250, %261 : vector<8x1xf32>
    %c4_i32 = arith.constant 4 : i32
    %265 = vector.broadcast %c4_i32 : i32 to vector<8x1xi32>
    %266 = arith.select %264, %265, %263 : vector<8x1xi1>, vector<8x1xi32>
    %c1_i32_94 = arith.constant 1 : i32
    %267 = vector.broadcast %c1_i32_94 : i32 to vector<8x1xi32>
    %268 = arith.cmpi eq, %266, %267 : vector<8x1xi32>
    %269 = vector.shape_cast %268 : vector<8x1xi1> to vector<8x1xi1>
    %270 = vector.broadcast %269 : vector<8x1xi1> to vector<8x128xi1>
    %271 = arith.select %270, %104, %72 : vector<8x128xi1>, vector<8x128xf32>
    %c2_i32_95 = arith.constant 2 : i32
    %272 = vector.broadcast %c2_i32_95 : i32 to vector<8x1xi32>
    %273 = arith.cmpi eq, %266, %272 : vector<8x1xi32>
    %274 = vector.shape_cast %273 : vector<8x1xi1> to vector<8x1xi1>
    %275 = vector.broadcast %274 : vector<8x1xi1> to vector<8x128xi1>
    %276 = arith.select %275, %116, %271 : vector<8x128xi1>, vector<8x128xf32>
    %c3_i32_96 = arith.constant 3 : i32
    %277 = vector.broadcast %c3_i32_96 : i32 to vector<8x1xi32>
    %278 = arith.cmpi eq, %266, %277 : vector<8x1xi32>
    %279 = vector.shape_cast %278 : vector<8x1xi1> to vector<8x1xi1>
    %280 = vector.broadcast %279 : vector<8x1xi1> to vector<8x128xi1>
    %281 = arith.select %280, %128, %276 : vector<8x128xi1>, vector<8x128xf32>
    %c4_i32_97 = arith.constant 4 : i32
    %282 = vector.broadcast %c4_i32_97 : i32 to vector<8x1xi32>
    %283 = arith.cmpi eq, %266, %282 : vector<8x1xi32>
    %284 = vector.shape_cast %283 : vector<8x1xi1> to vector<8x1xi1>
    %285 = vector.broadcast %284 : vector<8x1xi1> to vector<8x128xi1>
    %286 = arith.select %285, %140, %281 : vector<8x128xi1>, vector<8x128xf32>
    %287 = arith.subf %70, %71 : vector<8x128xf32>
    %288 = arith.mulf %287, %287 : vector<8x128xf32>
    %cst_98 = arith.constant dense<0.000000e+00> : vector<8xf32>
    %289 = vector.multi_reduction <add>, %288, %cst_98 [1] : vector<8x128xf32> to vector<8xf32>
    %290 = vector.shape_cast %289 : vector<8xf32> to vector<8x1xf32>
    %291 = arith.subf %70, %286 : vector<8x128xf32>
    %292 = arith.mulf %291, %291 : vector<8x128xf32>
    %cst_99 = arith.constant dense<0.000000e+00> : vector<8xf32>
    %293 = vector.multi_reduction <add>, %292, %cst_99 [1] : vector<8x128xf32> to vector<8xf32>
    %294 = vector.shape_cast %293 : vector<8xf32> to vector<8x1xf32>
    %295 = arith.subf %290, %294 : vector<8x1xf32>
    %cst_100 = arith.constant 1.000000e+00 : f32
    %296 = vector.broadcast %cst_100 : f32 to vector<8x1xf32>
    %297 = arith.addf %295, %296 : vector<8x1xf32>
    %cst_101 = arith.constant 0.000000e+00 : f32
    %298 = vector.broadcast %cst_101 : f32 to vector<8x1xf32>
    %299 = arith.maximumf %297, %298 : vector<8x1xf32>
    %cst_102 = arith.constant dense<0.000000e+00> : vector<1xf32>
    %300 = vector.multi_reduction <add>, %299, %cst_102 [0] : vector<8x1xf32> to vector<1xf32>
    %301 = vector.shape_cast %300 : vector<1xf32> to vector<1x1xf32>
    %cst_103 = arith.constant 1.250000e-01 : f32
    %302 = vector.broadcast %cst_103 : f32 to vector<1x1xf32>
    %303 = arith.mulf %301, %302 : vector<1x1xf32>
    %c0_104 = arith.constant 0 : index
    %304 = memref.load %arg0[%c0_104] : memref<1xf32, #tpu.memory_space<smem>>
    %305 = vector.broadcast %304 : f32 to vector<1x1xf32>
    %306 = arith.mulf %305, %90 : vector<1x1xf32>
    %cst_105 = arith.constant 1.000000e+00 : f32
    %307 = arith.subf %cst_105, %304 : f32
    %308 = vector.broadcast %307 : f32 to vector<1x1xf32>
    %309 = arith.mulf %308, %303 : vector<1x1xf32>
    %310 = arith.addf %306, %309 : vector<1x1xf32>
    %311 = tpu.iota {dimensions = array<i32: 1>} : vector<1x128xi32>
    %c0_i32_106 = arith.constant 0 : i32
    %312 = vector.broadcast %c0_i32_106 : i32 to vector<1x128xi32>
    %313 = arith.cmpi eq, %311, %312 : vector<1x128xi32>
    %cst_107 = arith.constant 0.000000e+00 : f32
    %314 = vector.shape_cast %310 : vector<1x1xf32> to vector<1x1xf32>
    %315 = vector.broadcast %314 : vector<1x1xf32> to vector<1x128xf32>
    %316 = vector.broadcast %cst_107 : f32 to vector<1x128xf32>
    %317 = arith.select %313, %315, %316 : vector<1x128xi1>, vector<1x128xf32>
    %c1_i32_108 = arith.constant 1 : i32
    %318 = vector.broadcast %c1_i32_108 : i32 to vector<1x128xi32>
    %319 = arith.cmpi eq, %311, %318 : vector<1x128xi32>
    %cst_109 = arith.constant 0.000000e+00 : f32
    %320 = vector.shape_cast %69 : vector<1x1xf32> to vector<1x1xf32>
    %321 = vector.broadcast %320 : vector<1x1xf32> to vector<1x128xf32>
    %322 = vector.broadcast %cst_109 : f32 to vector<1x128xf32>
    %323 = arith.select %319, %321, %322 : vector<1x128xi1>, vector<1x128xf32>
    %324 = arith.addf %317, %323 : vector<1x128xf32>
    %c2_i32_110 = arith.constant 2 : i32
    %325 = vector.broadcast %c2_i32_110 : i32 to vector<1x128xi32>
    %326 = arith.cmpi eq, %311, %325 : vector<1x128xi32>
    %cst_111 = arith.constant 0.000000e+00 : f32
    %327 = vector.shape_cast %230 : vector<1x1xf32> to vector<1x1xf32>
    %328 = vector.broadcast %327 : vector<1x1xf32> to vector<1x128xf32>
    %329 = vector.broadcast %cst_111 : f32 to vector<1x128xf32>
    %330 = arith.select %326, %328, %329 : vector<1x128xi1>, vector<1x128xf32>
    %331 = arith.addf %324, %330 : vector<1x128xf32>
    %c0_112 = arith.constant 0 : index
    %c0_113 = arith.constant 0 : index
    %332 = vector.load %arg12[%c0_112, %c0_113] : memref<1x128xf32, #tpu.memory_space<vmem>>, vector<1x128xf32>
    tpu.vector_store %arg12[%c0_112, %c0_113], %331 {strides = array<i32>} : memref<1x128xf32, #tpu.memory_space<vmem>>, vector<1x128xf32>,
    return
  }
}

</mosaic_0001>

<bundles_post_ra>
// kernel: triplet_cdml_forward.1
= control target key start
LH: loop header
LB: loop body
LE: loop exit
PB: predicated region body
PF: predicated region fallthrough
CT: control target
= control target key end

     0   :  { %vm139_vm0 = vcmask 1043456   ;;  %s3921_s0 = inlined_call_operand.<no memory space> [shape: f32[1], index: 0, kind: input, shape index: {}]   ;;  %s3922_s1 = inlined_call_operand.vmem [shape: f32[24,4,256], index: 1, kind: input, shape index: {}]   ;;  %s3923_s2 = inlined_call_operand.vmem [shape: s32[24,1], index: 2, kind: input, shape index: {}]   ;;  %s3924_s3 = inlined_call_operand.vmem [shape: f32[4,1024], index: 3, kind: input, shape index: {}]   ;;  %s3925_s4 = inlined_call_operand.vmem [shape: f32[1,1024], index: 4, kind: input, shape index: {}]   ;;  %s3926_s5 = inlined_call_operand.vmem [shape: f32[1,1024], index: 5, kind: input, shape index: {}]   ;;  %s3927_s6 = inlined_call_operand.vmem [shape: f32[1,1024], index: 6, kind: input, shape index: {}]   ;;  %s3928_s7 = inlined_call_operand.vmem [shape: bf16[1024,128], index: 7, kind: input, shape index: {}]   ;;  %s3929_s8 = inlined_call_operand.vmem [shape: f32[1,128], index: 8, kind: input, shape index: {}]   ;;  %s3930_s9 = inlined_call_operand.vmem [shape: f32[128,128], index: 9, kind: input, shape index: {}]   ;;  %s3931_s10 = inlined_call_operand.vmem [shape: f32[1,128], index: 10, kind: input, shape index: {}]   ;;  %s3932_s11 = inlined_call_operand.hbm [shape: f32[24,128], index: 11, kind: output, shape index: {0}]   ;;  %s3933_s12 = inlined_call_operand.vmem [shape: f32[1,128], index: 12, kind: output, shape index: {1}]  }
   0x1   :  { %v45_v0 = vld [vmem:[%s3922_s1 + $0x10] sm:$0xff]  ;;  %v43_v1 = vld [vmem:[%s3922_s1] sm:$0xff]  ;;  %v46_v2 = vld [vmem:[%s3922_s1 + $0x18] sm:$0xff] }
   0x2   :  { %v93_v3 = vcombine.high %v45_v0, %v45_v0  ;;  %v150_v4 = vsel %vm139_vm0, %v45_v0, 0.0  ;;  %v91_v5 = vcombine.high %v43_v1, %v43_v1  ;;  %v140_v6 = vsel %vm139_vm0, %v43_v1, 0.0  ;;  %v44_v7 = vld [vmem:[%s3922_s1 + $0x8] sm:$0xff]  ;;  %v47_v12 = vld [vmem:[%s3922_s1 + $0x20] sm:$0xff]  ;;  %v53_v29 = vld [vmem:[%s3922_s1 + $0x50] sm:$0xff] }
   0x3   :  { %v48_v8 = vld [vmem:[%s3922_s1 + $0x28] sm:$0xff]  ;;  %v94_v9 = vcombine.high %v46_v2, %v46_v2  ;;  %v155_v10 = vsel %vm139_vm0, %v46_v2, 0.0  ;;  %v92_v11 = vcombine.high %v44_v7, %v44_v7  ;;  %v145_v15 = vsel %vm139_vm0, %v44_v7, 0.0  ;;  %v51_v22 = vld [vmem:[%s3922_s1 + $0x40] sm:$0xff]  ;;  %v49_v33 = vld [vmem:[%s3922_s1 + $0x30] sm:$0xff] }
   0x4   :  { %v151_v13 = vsel %vm139_vm0, %v93_v3, 0.0  ;;  %v141_v14 = vsel %vm139_vm0, %v91_v5, 0.0  ;;  %v96_v16 = vcombine.high %v48_v8, %v48_v8  ;;  %v52_v17 = vld [vmem:[%s3922_s1 + $0x48] sm:$0xff]  ;;  %v165_v23 = vsel %vm139_vm0, %v48_v8, 0.0  ;;  %v54_v36 = vld [vmem:[%s3922_s1 + $0x58] sm:$0xff]  ;;  %v55_v52 = vld [vmem:[%s3922_s1 + $0x60] sm:$0xff] }
   0x5   :  { %v152_v18 = vadd.f32 %v151_v13, %v150_v4  ;;  %v142_v19 = vadd.f32 %v141_v14, %v140_v6  ;;  %v156_v20 = vsel %vm139_vm0, %v94_v9, 0.0  ;;  %v146_v21 = vsel %vm139_vm0, %v92_v11, 0.0  ;;  %v50_v43 = vld [vmem:[%s3922_s1 + $0x38] sm:$0xff]  ;;  %v56_v47 = vld [vmem:[%s3922_s1 + $0x68] sm:$0xff]  ;;  %v59_v55 = vld [vmem:[%s3922_s1 + $0x80] sm:$0xff] }
   0x6   :  { %v95_v24 = vcombine.high %v47_v12, %v47_v12  ;;  %v157_v25 = vadd.f32 %v156_v20, %v155_v10  ;;  %v147_v26 = vadd.f32 %v146_v21, %v145_v15  ;;  %v166_v27 = vsel %vm139_vm0, %v96_v16, 0.0  ;;  %v60_v53 = vld [vmem:[%s3922_s1 + $0x88] sm:$0xff]  ;;  %v61_v56 = vld [vmem:[%s3922_s1 + $0x90] sm:$0xff]  ;;  %v62_v3 = vld [vmem:[%s3922_s1 + $0x98] sm:$0xff] }
   0x7   :  { %153 = vadd.xlane.f32.xlu1 %v152_v18  ;;  %143 = vadd.xlane.f32.xlu0 %v142_v19  ;;  %v100_v28 = vcombine.high %v52_v17, %v52_v17  ;;  %v160_v30 = vsel %vm139_vm0, %v47_v12, 0.0  ;;  %v99_v32 = vcombine.high %v51_v22, %v51_v22  ;;  %v167_v34 = vadd.f32 %v166_v27, %v165_v23  ;;  %v57_v59 = vld [vmem:[%s3922_s1 + $0x70] sm:$0xff]  ;;  %v58_v6 = vld [vmem:[%s3922_s1 + $0x78] sm:$0xff] }
   0x8   :  { %v161_v31 = vsel %vm139_vm0, %v95_v24, 0.0  ;;  %v101_v35 = vcombine.high %v53_v29, %v53_v29  ;;  %v185_v38 = vsel %vm139_vm0, %v52_v17, 0.0  ;;  %v97_v40 = vcombine.high %v49_v33, %v49_v33 }
   0x9   :  { %v162_v37 = vadd.f32 %v161_v31, %v160_v30  ;;  %v186_v39 = vsel %vm139_vm0, %v100_v28, 0.0  ;;  %v180_v41 = vsel %vm139_vm0, %v51_v22, 0.0  ;;  %v181_v42 = vsel %vm139_vm0, %v99_v32, 0.0  ;;  %v64_v30 = vld [vmem:[%s3922_s1 + $0xa8] sm:$0xff] }
   0xa   :  { %v187_v44 = vadd.f32 %v186_v39, %v185_v38  ;;  %v190_v45 = vsel %vm139_vm0, %v53_v29, 0.0  ;;  %v191_v46 = vsel %vm139_vm0, %v101_v35, 0.0  ;;  %v182_v48 = vadd.f32 %v181_v42, %v180_v41 }
   0xb   :  { %158 = vadd.xlane.f32.xlu1 %v157_v25  ;;  %148 = vadd.xlane.f32.xlu0 %v147_v26  ;;  %v170_v49 = vsel %vm139_vm0, %v49_v33, 0.0  ;;  %v171_v50 = vsel %vm139_vm0, %v97_v40, 0.0  ;;  %v102_v51 = vcombine.high %v54_v36, %v54_v36  ;;  %v98_v54 = vcombine.high %v50_v43, %v50_v43  ;;  %v63_v25 = vld [vmem:[%s3922_s1 + $0xa0] sm:$0xff] }
   0xc   :  { %v192_v57 = vadd.f32 %v191_v46, %v190_v45  ;;  %v172_v58 = vadd.f32 %v171_v50, %v170_v49  ;;  %v195_v60 = vsel %vm139_vm0, %v54_v36, 0.0  ;;  %v104_v62 = vcombine.high %v56_v47, %v56_v47  ;;  %v65_v36 = vld [vmem:[%s3922_s1 + $0xb0] sm:$0xff] }
   0xd   :  { %v196_v61 = vsel %vm139_vm0, %v102_v51, 0.0  ;;  %v103_v63 = vcombine.high %v55_v52, %v55_v52  ;;  %v175_v0 = vsel %vm139_vm0, %v50_v43, 0.0  ;;  %v176_v1 = vsel %vm139_vm0, %v98_v54, 0.0 }
   0xe   :  { %v108_v2 = vcombine.high %v60_v53, %v60_v53  ;;  %v107_v4 = vcombine.high %v59_v55, %v59_v55  ;;  %v109_v5 = vcombine.high %v61_v56, %v61_v56  ;;  %v197_v7 = vadd.f32 %v196_v61, %v195_v60 }
   0xf   :  { %168 = vadd.xlane.f32.xlu1 %v167_v34  ;;  %163 = vadd.xlane.f32.xlu0 %v162_v37  ;;  %v205_v8 = vsel %vm139_vm0, %v56_v47, 0.0  ;;  %v200_v9 = vsel %vm139_vm0, %v55_v52, 0.0  ;;  %v105_v10 = vcombine.high %v57_v59, %v57_v59  ;;  %v177_v11 = vadd.f32 %v176_v1, %v175_v0  ;;  %v66_v37 = vld [vmem:[%s3922_s1 + $0xb8] sm:$0xff]  ;;  %v284_v47 = vld [vmem:[%s3924_s3] sm:$0xff] }
  0x10   :  { %v206_v12 = vsel %vm139_vm0, %v104_v62, 0.0  ;;  %v201_v13 = vsel %vm139_vm0, %v103_v63, 0.0  ;;  %v110_v14 = vcombine.high %v62_v3, %v62_v3  ;;  %v225_v15 = vsel %vm139_vm0, %v60_v53, 0.0 }
  0x11   :  { %v226_v16 = vsel %vm139_vm0, %v108_v2, 0.0  ;;  %v220_v17 = vsel %vm139_vm0, %v59_v55, 0.0  ;;  %v230_v18 = vsel %vm139_vm0, %v61_v56, 0.0  ;;  %v221_v19 = vsel %vm139_vm0, %v107_v4, 0.0 }
  0x12   :  { %v231_v20 = vsel %vm139_vm0, %v109_v5, 0.0  ;;  %v210_v21 = vsel %vm139_vm0, %v57_v59, 0.0  ;;  %v106_v22 = vcombine.high %v58_v6, %v58_v6  ;;  %v211_v23 = vsel %vm139_vm0, %v105_v10, 0.0 }
  0x13   :  { %188 = vadd.xlane.f32.xlu1 %v187_v44  ;;  %183 = vadd.xlane.f32.xlu0 %v182_v48  ;;  %v235_v24 = vsel %vm139_vm0, %v62_v3, 0.0  ;;  %v207_v26 = vadd.f32 %v206_v12, %v205_v8  ;;  %v202_v27 = vadd.f32 %v201_v13, %v200_v9  ;;  %v236_v28 = vsel %vm139_vm0, %v110_v14, 0.0  ;;  %v286_v48 = vld [vmem:[%s3924_s3 + $0x10] sm:$0xff] }
  0x14   :  { %v215_v29 = vsel %vm139_vm0, %v58_v6, 0.0  ;;  %v216_v31 = vsel %vm139_vm0, %v106_v22, 0.0  ;;  %v240_v32 = vsel %vm139_vm0, %v63_v25, 0.0  ;;  %v227_v33 = vadd.f32 %v226_v16, %v225_v15 }
  0x15   :  { %v222_v34 = vadd.f32 %v221_v19, %v220_v17  ;;  %v111_v35 = vcombine.high %v63_v25, %v63_v25  ;;  %v112_v38 = vcombine.high %v64_v30, %v64_v30  ;;  %v232_v39 = vadd.f32 %v231_v20, %v230_v18 }
  0x16   :  { %v212_v40 = vadd.f32 %v211_v23, %v210_v21  ;;  %v245_v42 = vsel %vm139_vm0, %v64_v30, 0.0  ;;  %v113_v44 = vcombine.high %v65_v36, %v65_v36  ;;  %v250_v45 = vsel %vm139_vm0, %v65_v36, 0.0 }
  0x17   :  { %193 = vadd.xlane.f32.xlu1 %v192_v57  ;;  %173 = vadd.xlane.f32.xlu0 %v172_v58  ;;  %v241_v41 = vsel %vm139_vm0, %v111_v35, 0.0  ;;  %v246_v43 = vsel %vm139_vm0, %v112_v38, 0.0  ;;  %v114_v46 = vcombine.high %v66_v37, %v66_v37  ;;  %v484_v49 = vcombine.high %v284_v47, %v284_v47 }
  0x18   :  { %v486_v50 = vcombine.high %v286_v48, %v286_v48  ;;  %v237_v51 = vadd.f32 %v236_v28, %v235_v24  ;;  %v217_v52 = vadd.f32 %v216_v31, %v215_v29  ;;  %v255_v53 = vsel %vm139_vm0, %v66_v37, 0.0 }
  0x19   :  { %2389 = vmatprep.subr.msk.mxu1 %vm139_vm0, %v484_v49  ;;  %v251_v54 = vsel %vm139_vm0, %v113_v44, 0.0  ;;  %v256_v55 = vsel %vm139_vm0, %v114_v46, 0.0  ;;  %v2848_v56 = vmov 0.0   ;;  %v242_v57 = vadd.f32 %v241_v41, %v240_v32 }
  0x1a   :  { %2399 = vmatprep.subr.msk.mxu0 %vm139_vm0, %v486_v50  ;;  %2390 = vmatpush1.msk.msra.mxu1 %vm139_vm0, %v284_v47  ;;  %v247_v58 = vadd.f32 %v246_v43, %v245_v42  ;;  %v252_v59 = vadd.f32 %v251_v54, %v250_v45  ;;  %v257_v60 = vadd.f32 %v256_v55, %v255_v53 }
  0x1b   :  { %198 = vadd.xlane.f32.xlu1 %v197_v7  ;;  %178 = vadd.xlane.f32.xlu0 %v177_v11 }
  0x1c   :  { %575 = vmatprep.mubr.f32.mxu1 %v2848_v56  ;;  %2400 = vmatpush1.msk.msra.mxu0 %vm139_vm0, %v286_v48 }
  0x1d   :  { %741 = vmatprep.mubr.f32.mxu0 %v2848_v56 }
  0x1f   :  { %208 = vadd.xlane.f32.xlu1 %v207_v26  ;;  %203 = vadd.xlane.f32.xlu0 %v202_v27 }
  0x23   :  { %228 = vadd.xlane.f32.xlu1 %v227_v33  ;;  %223 = vadd.xlane.f32.xlu0 %v222_v34 }
  0x27   :  { %233 = vadd.xlane.f32.xlu1 %v232_v39  ;;  %213 = vadd.xlane.f32.xlu0 %v212_v40 }
  0x2b   :  { %238 = vadd.xlane.f32.xlu1 %v237_v51  ;;  %218 = vadd.xlane.f32.xlu0 %v217_v52 }
  0x2f   :  { %243 = vadd.xlane.f32.xlu0 %v242_v57  ;;  %248 = vadd.xlane.f32.xlu1 %v247_v58 }
  0x33   :  { %253 = vadd.xlane.f32.xlu0 %v252_v59  ;;  %258 = vadd.xlane.f32.xlu1 %v257_v60 }
  0x34   :  { %19 = vsyncpa [#allocation4], 0  ;;  %v3054_v61 = vld [vmem:[%s3924_s3 + $0x8] sm:$0xff]  ;;  %v290_v63 = vlaneseq  ;;  %vm452_vm1 = vcmask 1041409   ;;  %vm454_vm2 = vcmask 1042434   ;;  %vm456_vm3 = vcmask 1043459  }
  0x35   :  { %v485_v62 = vcombine.high %v3054_v61, %v3054_v61  ;;  %vm458_vm4 = vcmask 1044484   ;;  %vm460_vm5 = vcmask 1045509   ;;  %vm462_vm6 = vcmask 1046534   ;;  %v3081_v34 = vld [vmem:[%s3924_s3 + $0x18] sm:$0xff] }
  0x36   :  { %v3059_v2 = vshrl.u32 %v290_v63, 7  ;;  %v3061_v3 = vand.u32 127, %v290_v63  ;;  %vm464_vm7 = vcmask 1047559   ;;  %vm488_vm8 = vcmask 31744  }
  0x37   :  { %2394 = vmatprep.subr.msk.mxu1 %vm139_vm0, %v485_v62  ;;  %v487_v43 = vcombine.high %v3081_v34, %v3081_v34  ;;  %vm2849_vm9 = vmmov 0  }
  0x38   :  { %v3065_v6 = vsub.s32 %v3061_v3, %v3059_v2 }
  0x90   :  { %v154_v0 = vpop.xlane.xlu1 %153  ;;  %v144_v1 = vpop.xlane.xlu0 %143 }
  0x91   :  { %v260_v7 = vmul.f32 0.00390625, %v144_v1  ;;  %v262_v10 = vmul.f32 0.00390625, %v154_v0 }
  0x93   :  { %v359_v13 = vrot.slane %v260_v7, %v3065_v6  ;;  %v367_v16 = vrot.slane %v262_v10, %v3065_v6 }
  0x94   :  { %v159_v4 = vpop.xlane.xlu1 %158  ;;  %v149_v5 = vpop.xlane.xlu0 %148 }
  0x95   :  { %v261_v8 = vmul.f32 0.00390625, %v149_v5  ;;  %v263_v14 = vmul.f32 0.00390625, %v159_v4 }
  0x97   :  { %v363_v9 = vrot.slane %v261_v8, %v3065_v6  ;;  %v371_v20 = vrot.slane %v263_v14, %v3065_v6 }
  0x98   :  { %v169_v11 = vpop.xlane.xlu1 %168  ;;  %v164_v12 = vpop.xlane.xlu0 %163 }
  0x99   :  { %v453_v15 = vsel %vm452_vm1, %v363_v9, %v359_v13  ;;  %v264_v17 = vmul.f32 0.00390625, %v164_v12  ;;  %v265_v22 = vmul.f32 0.00390625, %v169_v11 }
  0x9a   :  { %v455_v21 = vsel %vm454_vm2, %v367_v16, %v453_v15 }
  0x9b   :  { %v375_v23 = vrot.slane %v264_v17, %v3065_v6  ;;  %v457_v26 = vsel %vm456_vm3, %v371_v20, %v455_v21  ;;  %v379_v28 = vrot.slane %v265_v22, %v3065_v6 }
  0x9c   :  { %v189_v18 = vpop.xlane.xlu1 %188  ;;  %v184_v19 = vpop.xlane.xlu0 %183 }
  0x9d   :  { %v459_v29 = vsel %vm458_vm4, %v375_v23, %v457_v26  ;;  %v269_v40 = vmul.f32 0.00390625, %v189_v18  ;;  %v268_v41 = vmul.f32 0.00390625, %v184_v19 }
  0x9e   :  { %v461_v36 = vsel %vm460_vm5, %v379_v28, %v459_v29 }
  0x9f   :  { %v395_v49 = vrot.slane %v269_v40, %v3065_v6  ;;  %v391_v50 = vrot.slane %v268_v41, %v3065_v6  ;;  %v2717_v40 = vld [vmem:[%s3928_s7 + $0x30] sm:$0xff]   ;;  %v2718_v41 = vld [vmem:[%s3928_s7 + $0x68] sm:$0xff]  }
  0xa0   :  { %v194_v24 = vpop.xlane.xlu1 %193  ;;  %v174_v25 = vpop.xlane.xlu0 %173 }
  0xa1   :  { %v266_v27 = vmul.f32 0.00390625, %v174_v25  ;;  %v270_v44 = vmul.f32 0.00390625, %v194_v24  ;;  %v466_v58 = vsel %vm452_vm1, %v395_v49, %v391_v50  ;;  %v2726_v49 = vld [vmem:[%s3928_s7 + $0x18] sm:$0xff]   ;;  %v2727_v50 = vld [vmem:[%s3928_s7 + $0xb0] sm:$0xff]  }
  0xa3   :  { %v383_v30 = vrot.slane %v266_v27, %v3065_v6  ;;  %v399_v51 = vrot.slane %v270_v44, %v3065_v6  ;;  %v2721_v44 = vld [vmem:[%s3928_s7 + $0xf8] sm:$0xff]  }
  0xa4   :  { %v199_v31 = vpop.xlane.xlu1 %198  ;;  %v179_v32 = vpop.xlane.xlu0 %178 }
  0xa5   :  { %v267_v33 = vmul.f32 0.00390625, %v179_v32  ;;  %v463_v39 = vsel %vm462_vm6, %v383_v30, %v461_v36  ;;  %v271_v45 = vmul.f32 0.00390625, %v199_v31  ;;  %v467_v60 = vsel %vm454_vm2, %v399_v51, %v466_v58  ;;  %v2728_v51 = vld [vmem:[%s3928_s7 + $0x50] sm:$0xff]   ;;  %v2734_v58 = vld [vmem:[%s3928_s7 + $0x8] sm:$0xff]  }
  0xa7   :  { %v387_v35 = vrot.slane %v267_v33, %v3065_v6  ;;  %v403_v52 = vrot.slane %v271_v45, %v3065_v6  ;;  %v2722_v45 = vld [vmem:[%s3928_s7 + $0x20] sm:$0xff]  }
  0xa8   :  { %v209_v37 = vpop.xlane.xlu1 %208  ;;  %v204_v38 = vpop.xlane.xlu0 %203 }
  0xa9   :  { %v3087_v42 = vsel %vm464_vm7, %v387_v35, %v463_v39  ;;  %v272_v46 = vmul.f32 0.00390625, %v204_v38  ;;  %v273_v53 = vmul.f32 0.00390625, %v209_v37  ;;  %v468_v63 = vsel %vm456_vm3, %v403_v52, %v467_v60  ;;  %v2716_v39 = vld [vmem:[%s3928_s7 + $0x70] sm:$0xff]   ;;  %v2729_v52 = vld [vmem:[%s3928_s7 + $0xe8] sm:$0xff]   ;;  %v2736_v60 = vld [vmem:[%s3928_s7 + $0x40] sm:$0xff]  }
  0xaa   :  { %2391 = vmatmul.mubr.msk.f32.vlgmr.msra.gmra.mxu1 %vm488_vm8, %v3087_v42  ;;  %2401 = vmatmul.mubr.msk.f32.vlgmr.msra.gmra.mxu0 %vm488_vm8, %v3087_v42 }
  0xab   :  { %581 = vmatprep.mubr.f32.mxu1 %v2848_v56  ;;  %747 = vmatprep.mubr.f32.mxu0 %v2848_v56  ;;  %v407_v54 = vrot.slane %v272_v46, %v3065_v6  ;;  %v411_v0 = vrot.slane %v273_v53, %v3065_v6  ;;  %v2723_v46 = vld [vmem:[%s3928_s7 + $0xb8] sm:$0xff]   ;;  %v2730_v53 = vld [vmem:[%s3928_s7 + $0x10] sm:$0xff]  }
  0xac   :  { %v229_v47 = vpop.xlane.xlu1 %228  ;;  %v224_v48 = vpop.xlane.xlu0 %223  ;;  %2395 = vmatpush1.msk.msra.mxu1 %vm139_vm0, %v3054_v61 }
  0xad   :  { %2404 = vmatprep.subr.msk.mxu1 %vm139_vm0, %v487_v43  ;;  %v277_v61 = vmul.f32 0.00390625, %v229_v47  ;;  %v276_v62 = vmul.f32 0.00390625, %v224_v48  ;;  %v469_v4 = vsel %vm458_vm4, %v407_v54, %v468_v63  ;;  %v2720_v43 = vld [vmem:[%s3928_s7 + $0x60] sm:$0xff]   ;;  %v2724_v47 = vld [vmem:[%s3928_s7 + $0x58] sm:$0xff]   ;;  %v2725_v48 = vld [vmem:[%s3928_s7 + $0xf0] sm:$0xff]  }
  0xae   :  { %v470_v15 = vsel %vm460_vm5, %v411_v0, %v469_v4  ;;  %v2731_v54 = vld [vmem:[%s3928_s7 + $0xa8] sm:$0xff]   ;;  %v2739_v63 = vld [vmem:[%s3928_s7 + $0x98] sm:$0xff]   ;;  %v2740_v0 = vld [vmem:[%s3928_s7 + $0xd0] sm:$0xff]  }
  0xaf   :  { %v427_v11 = vrot.slane %v277_v61, %v3065_v6  ;;  %v423_v12 = vrot.slane %v276_v62, %v3065_v6  ;;  %v2737_v61 = vld [vmem:[%s3928_s7 + $0xd8] sm:$0xff]   ;;  %v2738_v62 = vld [vmem:[%s3928_s7] sm:$0xff]   ;;  %v2742_v4 = vld [vmem:[%s3928_s7 + $0x90] sm:$0xff]  }
  0xb0   :  { %v234_v55 = vpop.xlane.xlu1 %233  ;;  %v214_v57 = vpop.xlane.xlu0 %213 }
  0xb1   :  { %v274_v59 = vmul.f32 0.00390625, %v214_v57  ;;  %v278_v1 = vmul.f32 0.00390625, %v234_v55  ;;  %v473_v23 = vsel %vm452_vm1, %v427_v11, %v423_v12  ;;  %v2732_v55 = vld [vmem:[%s3928_s7 + $0x48] sm:$0xff]   ;;  %v2733_v57 = vld [vmem:[%s3928_s7 + $0xe0] sm:$0xff]  }
  0xb3   :  { %v415_v5 = vrot.slane %v274_v59, %v3065_v6  ;;  %v431_v13 = vrot.slane %v278_v1, %v3065_v6  ;;  %v2735_v59 = vld [vmem:[%s3928_s7 + $0xa0] sm:$0xff]   ;;  %v2741_v1 = vld [vmem:[%s3928_s7 + $0x178] sm:$0xff]  }
  0xb4   :  { %v239_v7 = vpop.xlane.xlu1 %238  ;;  %v219_v8 = vpop.xlane.xlu0 %218 }
  0xb5   :  { %v279_v9 = vmul.f32 0.00390625, %v239_v7  ;;  %v275_v10 = vmul.f32 0.00390625, %v219_v8  ;;  %v471_v19 = vsel %vm462_vm6, %v415_v5, %v470_v15  ;;  %v474_v24 = vsel %vm454_vm2, %v431_v13, %v473_v23  ;;  %v2744_v5 = vld [vmem:[%s3928_s7 + $0xc8] sm:$0xff]   ;;  %v2748_v8 = vld [vmem:[%s3928_s7 + $0xc0] sm:$0xff]  }
  0xb6   :  { %v2746_v7 = vld [vmem:[%s3928_s7 + $0x88] sm:$0xff]   ;;  %v3255_v15 = vsub.s32 0, %v3059_v2 }
  0xb7   :  { %v419_v14 = vrot.slane %v275_v10, %v3065_v6  ;;  %v435_v16 = vrot.slane %v279_v9, %v3065_v6  ;;  %v2750_v9 = vld [vmem:[%s3928_s7 + $0x80] sm:$0xff]   ;;  %v2753_v10 = vld [vmem:[%s3928_s7 + $0x1f8] sm:$0xff]  }
  0xb8   :  { %v244_v17 = vpop.xlane.xlu0 %243  ;;  %v249_v18 = vpop.xlane.xlu1 %248 }
  0xb9   :  { %v280_v20 = vmul.f32 0.00390625, %v244_v17  ;;  %v281_v21 = vmul.f32 0.00390625, %v249_v18  ;;  %v472_v22 = vsel %vm464_vm7, %v419_v14, %v471_v19  ;;  %v475_v26 = vsel %vm456_vm3, %v435_v16, %v474_v24  ;;  %v3263_v19 = vld [vmem:[%s3925_s4] sm:$0xff] }
  0xba   :  { %2392 = vmatmul.mubr.msk.f32.gmra.mxu1 %vm488_vm8, %v472_v22  ;;  %2402 = vmatmul.mubr.msk.f32.gmra.mxu0 %vm488_vm8, %v472_v22  ;;  %v3258_v16 = vsub.s32 4, %v3059_v2 }
  0xbb   :  { %v439_v25 = vrot.slane %v280_v20, %v3065_v6  ;;  %587 = vmatprep.mubr.f32.mxu1 %v2848_v56  ;;  %753 = vmatprep.mubr.f32.mxu0 %v2848_v56  ;;  %v443_v27 = vrot.slane %v281_v21, %v3065_v6  ;;  %v3266_v20 = vsub.s32 1, %v3059_v2  ;;  %v3269_v21 = vsub.s32 5, %v3059_v2 }
  0xbc   :  { %v254_v28 = vpop.xlane.xlu0 %253  ;;  %v259_v29 = vpop.xlane.xlu1 %258  ;;  %v309_v23 = vrot.slane %v3263_v19, %v3258_v16 }
  0xbd   :  { %v476_v30 = vsel %vm458_vm4, %v439_v25, %v475_v26  ;;  %v282_v31 = vmul.f32 0.00390625, %v254_v28  ;;  %v283_v32 = vmul.f32 0.00390625, %v259_v29  ;;  %v297_v26 = vrot.slane %v3263_v19, %v3266_v20 }
  0xbe   :  { %v477_v36 = vsel %vm460_vm5, %v443_v27, %v476_v30  ;;  %v313_v27 = vrot.slane %v3263_v19, %v3269_v21 }
  0xbf   :  { %v447_v33 = vrot.slane %v282_v31, %v3065_v6  ;;  %v451_v35 = vrot.slane %v283_v32, %v3065_v6  ;;  %v2714_v6 = vld [vmem:[%s3928_s7 + $0x78] sm:$0xff]  }
  0xc0   :  { %2478 = vmatprep.subr.bf16.mxu0 %v2714_v6 }
  0xc1   :  { %v478_v37 = vsel %vm462_vm6, %v447_v33, %v477_v36 }
  0xc2   :  { %v479_v38 = vsel %vm464_vm7, %v451_v35, %v478_v37 }
  0xc3   :  { %2393 = vmatmul.mubr.msk.f32.gmra.mxu1 %vm488_vm8, %v479_v38  ;;  %2403 = vmatmul.mubr.msk.f32.gmra.mxu0 %vm488_vm8, %v479_v38 }
  0xc4   :  { %658 = vmatprep.mubr.f32.mxu1 %v2848_v56 }
  0xc7   :  { %2396 = vmatmul.mubr.msk.f32.vlgmr.msra.gmra.mxu1 %vm488_vm8, %v3087_v42 }
  0xc8   :  { %664 = vmatprep.mubr.f32.mxu1 %v2848_v56  ;;  %2405 = vmatpush1.msk.msra.mxu1 %vm139_vm0, %v3081_v34  ;;  %v2715_v34 = vld [vmem:[%s3928_s7 + $0x38] sm:$0xff]  }
  0xc9   :  { %2479 = vmatpush3.bf16.msra.mxu0 %v2715_v34  ;;  %2506 = vmatprep.subr.bf16.mxu1 %v2721_v44 }
  0xca   :  { %2480 = vmatprep.subr.bf16.mxu0 %v2716_v39 }
  0xcb   :  { %2397 = vmatmul.mubr.msk.f32.gmra.mxu1 %vm488_vm8, %v472_v22 }
  0xcc   :  { %670 = vmatprep.mubr.f32.mxu1 %v2848_v56 }
  0xcd   :  { %2481 = vmatpush3.bf16.msra.mxu0 %v2717_v40 }
  0xce   :  { %2482 = vmatprep.subr.bf16.mxu0 %v2718_v41 }
  0xcf   :  { %2398 = vmatmul.mubr.msk.f32.gmra.mxu1 %vm488_vm8, %v479_v38 }
  0xd0   :  { %824 = vmatprep.mubr.f32.mxu1 %v2848_v56 }
  0xd3   :  { %2406 = vmatmul.mubr.msk.f32.vlgmr.msra.gmra.mxu1 %vm488_vm8, %v3087_v42  ;;  %v2719_v42 = vld [vmem:[%s3928_s7 + $0x28] sm:$0xff]  }
  0xd4   :  { %830 = vmatprep.mubr.f32.mxu1 %v2848_v56  ;;  %2483 = vmatpush3.bf16.msra.mxu0 %v2719_v42 }
  0xd5   :  { %2484 = vmatprep.subr.bf16.mxu0 %v2720_v43  ;;  %2507 = vmatpush3.bf16.msra.mxu1 %v2723_v46 }
  0xd6   :  { %2508 = vmatprep.subr.bf16.mxu1 %v2725_v48 }
  0xd7   :  { %2407 = vmatmul.mubr.msk.f32.gmra.mxu1 %vm488_vm8, %v472_v22  ;;  %v293_v22 = vrot.slane %v3263_v19, %v3255_v15 }
  0xd8   :  { %836 = vmatprep.mubr.f32.mxu1 %v2848_v56  ;;  %2485 = vmatpush3.bf16.msra.mxu0 %v2722_v45 }
  0xd9   :  { %2486 = vmatprep.subr.bf16.mxu0 %v2724_v47  ;;  %2509 = vmatpush3.bf16.msra.mxu1 %v2727_v50 }
  0xda   :  { %2510 = vmatprep.subr.bf16.mxu1 %v2729_v52 }
  0xdb   :  { %2408 = vmatmul.mubr.msk.f32.gmra.mxu1 %vm488_vm8, %v479_v38 }
  0xdc   :  { %2487 = vmatpush3.bf16.msra.mxu0 %v2726_v49 }
  0xdd   :  { %2488 = vmatprep.subr.bf16.mxu0 %v2728_v51  ;;  %2511 = vmatpush3.bf16.msra.mxu1 %v2731_v54  ;;  %v3313_v54 = vsub.s32 2, %v3059_v2 }
  0xde   :  { %2512 = vmatprep.subr.bf16.mxu1 %v2733_v57 }
  0xe0   :  { %2489 = vmatpush3.bf16.msra.mxu0 %v2730_v53 }
  0xe1   :  { %2490 = vmatprep.subr.bf16.mxu0 %v2732_v55  ;;  %2513 = vmatpush3.bf16.msra.mxu1 %v2735_v59 }
  0xe2   :  { %2514 = vmatprep.subr.bf16.mxu1 %v2737_v61 }
  0xe4   :  { %2491 = vmatpush3.bf16.msra.mxu0 %v2734_v58 }
  0xe5   :  { %2492 = vmatprep.subr.bf16.mxu0 %v2736_v60  ;;  %2515 = vmatpush3.bf16.msra.mxu1 %v2739_v63 }
  0xe6   :  { %2516 = vmatprep.subr.bf16.mxu1 %v2740_v0 }
  0xe8   :  { %2493 = vmatpush3.bf16.msra.mxu0 %v2738_v62 }
  0xe9   :  { %2534 = vmatprep.subr.bf16.mxu0 %v2741_v1  ;;  %2517 = vmatpush3.bf16.msra.mxu1 %v2742_v4  ;;  %v301_v4 = vrot.slane %v3263_v19, %v3313_v54 }
  0xea   :  { %2518 = vmatprep.subr.bf16.mxu1 %v2744_v5 }
  0xed   :  { %2519 = vmatpush3.bf16.msra.mxu1 %v2746_v7 }
  0xee   :  { %2520 = vmatprep.subr.bf16.mxu1 %v2748_v8 }
  0xf1   :  { %2521 = vmatpush3.bf16.msra.mxu1 %v2750_v9 }
  0xf2   :  { %2562 = vmatprep.subr.bf16.mxu1 %v2753_v10 }
 0x16a   :  { %v577_v11 = vpop.f32.mrf.mxu1  ;;  %v743_v12 = vpop.f32.mrf.mxu0 }
 0x16b   :  { %v3287_v32 = vadd.f32 %v577_v11, %v293_v22  ;;  %v3289_v33 = vadd.f32 %v743_v12, %v309_v23  ;;  %v3318_v11 = vsub.s32 3, %v3059_v2 }
 0x16c   :  { %v579_v13 = vpop.f32.mrf.mxu1  ;;  %v745_v14 = vpop.f32.mrf.mxu0 }
 0x16d   :  { %v3291_v35 = vadd.f32 %v579_v13, %v297_v26  ;;  %v3293_v36 = vadd.f32 %v745_v14, %v313_v27 }
 0x17a   :  { %v583_v17 = vpop.f32.mrf.mxu1  ;;  %v749_v18 = vpop.f32.mrf.mxu0 }
 0x17b   :  { %v3279_v28 = vadd.f32 %v583_v17, %v293_v22  ;;  %v3281_v29 = vadd.f32 %v749_v18, %v309_v23 }
 0x17c   :  { %v585_v24 = vpop.f32.mrf.mxu1  ;;  %v751_v25 = vpop.f32.mrf.mxu0 }
 0x17d   :  { %v3283_v30 = vadd.f32 %v585_v24, %v297_v26  ;;  %v3285_v31 = vadd.f32 %v751_v25, %v313_v27  ;;  %v843_v6 = vadd.f32 %v3279_v28, %v3287_v32  ;;  %v875_v34 = vadd.f32 %v3281_v29, %v3289_v33 }
 0x17f   :  { %v851_v41 = vadd.f32 %v3283_v30, %v3291_v35  ;;  %v883_v42 = vadd.f32 %v3285_v31, %v3293_v36 }
 0x183   :  { %v589_v37 = vpop.f32.mrf.mxu1  ;;  %v755_v38 = vpop.f32.mrf.mxu0 }
 0x184   :  { %v590_v39 = vadd.f32 %v589_v37, %v293_v22  ;;  %v3299_v40 = vadd.f32 %v755_v38, %v309_v23 }
 0x185   :  { %v591_v43 = vpop.f32.mrf.mxu1  ;;  %v757_v44 = vpop.f32.mrf.mxu0 }
 0x186   :  { %v844_v45 = vadd.f32 %v843_v6, %v590_v39  ;;  %v876_v46 = vadd.f32 %v875_v34, %v3299_v40  ;;  %v3306_v47 = vadd.f32 %v591_v43, %v297_v26  ;;  %v3308_v48 = vadd.f32 %v757_v44, %v313_v27 }
 0x187   :  { %v660_v49 = vpop.f32.mrf.mxu1  ;;  %v305_v6 = vrot.slane %v3263_v19, %v3318_v11 }
 0x188   :  { %v845_v50 = vrot.slane %v844_v45, 4  ;;  %v877_v51 = vrot.slane %v876_v46, 4  ;;  %v852_v52 = vadd.f32 %v851_v41, %v3306_v47  ;;  %v884_v53 = vadd.f32 %v883_v42, %v3308_v48 }
 0x189   :  { %v662_v55 = vpop.f32.mrf.mxu1  ;;  %v3322_v23 = vadd.f32 %v660_v49, %v301_v4 }
 0x18a   :  { %v846_v57 = vadd.f32 %v845_v50, %v844_v45  ;;  %v878_v58 = vadd.f32 %v877_v51, %v876_v46  ;;  %v853_v59 = vrot.slane %v852_v52, 4  ;;  %v885_v60 = vrot.slane %v884_v53, 4 }
 0x18b   :  { %v666_v61 = vpop.f32.mrf.mxu1 }
 0x18c   :  { %v847_v62 = vrot.slane %v846_v57, 2  ;;  %v879_v63 = vrot.slane %v878_v58, 2  ;;  %v854_v0 = vadd.f32 %v853_v59, %v852_v52  ;;  %v886_v1 = vadd.f32 %v885_v60, %v884_v53 }
 0x18d   :  { %v668_v5 = vpop.f32.mrf.mxu1  ;;  %v3320_v12 = vadd.f32 %v666_v61, %v301_v4  ;;  %v3346_v59 = vadd.f32 %v662_v55, %v305_v6 }
 0x18e   :  { %v848_v7 = vadd.f32 %v847_v62, %v846_v57  ;;  %v880_v8 = vadd.f32 %v879_v63, %v878_v58  ;;  %v855_v9 = vrot.slane %v854_v0, 2  ;;  %v887_v10 = vrot.slane %v886_v1, 2 }
 0x18f   :  { %v672_v13 = vpop.f32.mrf.mxu1  ;;  %v859_v34 = vadd.f32 %v3320_v12, %v3322_v23  ;;  %v3330_v46 = vadd.f32 %v668_v5, %v305_v6  ;;  %v3360_v63 = vsub.s32 6, %v3059_v2 }
 0x190   :  { %v849_v14 = vrot.slane %v848_v7, 1  ;;  %v881_v17 = vrot.slane %v880_v8, 1  ;;  %v856_v18 = vadd.f32 %v855_v9, %v854_v0  ;;  %v888_v22 = vadd.f32 %v887_v10, %v886_v1 }
 0x191   :  { %v3324_v24 = vadd.f32 %v672_v13, %v301_v4  ;;  %v674_v25 = vpop.f32.mrf.mxu1  ;;  %v3365_v4 = vsub.s32 7, %v3059_v2 }
 0x192   :  { %v850_v26 = vadd.f32 %v849_v14, %v848_v7  ;;  %v882_v27 = vadd.f32 %v881_v17, %v880_v8  ;;  %v857_v37 = vrot.slane %v856_v18, 1  ;;  %v889_v38 = vrot.slane %v888_v22, 1 }
 0x193   :  { %v826_v41 = vpop.f32.mrf.mxu1  ;;  %v860_v53 = vadd.f32 %v859_v34, %v3324_v24  ;;  %v3348_v60 = vadd.f32 %v674_v25, %v305_v6  ;;  %v321_v6 = vrot.slane %v3263_v19, %v3365_v4 }
 0x194   :  { %v908_v42 = vmul.f32 0.041666668, %v850_v26  ;;  %v912_v43 = vmul.f32 0.041666668, %v882_v27  ;;  %v858_v44 = vadd.f32 %v857_v37, %v856_v18  ;;  %v890_v45 = vadd.f32 %v889_v38, %v888_v22 }
 0x195   :  { %v3332_v49 = vpop.f32.mrf.mxu1  ;;  %v861_v1 = vrot.slane %v860_v53, 4 }
 0x196   :  { %v3335_v50 = vsub.f32 %v3287_v32, %v908_v42  ;;  %v3338_v51 = vsub.f32 %v3279_v28, %v908_v42  ;;  %v3340_v52 = vsub.f32 %v590_v39, %v908_v42  ;;  %v3344_v57 = vsub.f32 %v3289_v33, %v912_v43 }
 0x197   :  { %v909_v58 = vmul.f32 0.041666668, %v858_v44  ;;  %v913_v28 = vmul.f32 0.041666668, %v890_v45  ;;  %v832_v62 = vpop.f32.mrf.mxu1  ;;  %v3355_v39 = vsub.f32 %v3281_v29, %v912_v43  ;;  %v867_v33 = vadd.f32 %v3330_v46, %v3346_v59 }
 0x198   :  { %v940_v61 = vmul.f32 %v3335_v50, %v3335_v50  ;;  %v948_v32 = vmul.f32 %v3338_v51, %v3338_v51  ;;  %v956_v55 = vmul.f32 %v3340_v52, %v3340_v52  ;;  %v944_v5 = vmul.f32 %v3344_v57, %v3344_v57 }
 0x199   :  { %v3370_v29 = vsub.f32 %v3291_v35, %v909_v58  ;;  %v3373_v7 = vsub.f32 %v3283_v30, %v909_v58  ;;  %v868_v8 = vadd.f32 %v867_v33, %v3348_v60  ;;  %v3377_v10 = vsub.f32 %v3306_v47, %v909_v58  ;;  %v834_v14 = vpop.f32.mrf.mxu1 }
 0x19a   :  { %v964_v0 = vadd.f32 %v948_v32, %v940_v61  ;;  %v3380_v13 = vsub.f32 %v3293_v36, %v913_v28  ;;  %v3383_v2 = vsub.f32 %v3285_v31, %v913_v28  ;;  %v952_v35 = vmul.f32 %v3355_v39, %v3355_v39 }
 0x19b   :  { %v941_v30 = vmul.f32 %v3370_v29, %v3370_v29  ;;  %v949_v17 = vmul.f32 %v3373_v7, %v3373_v7  ;;  %v3392_v18 = vsub.f32 %v3308_v48, %v913_v28  ;;  %v317_v31 = vrot.slane %v3263_v19, %v3360_v63  ;;  %v838_v34 = vpop.f32.mrf.mxu1 }
 0x19c   :  { %v965_v9 = vadd.f32 %v964_v0, %v956_v55  ;;  %v945_v36 = vmul.f32 %v3380_v13, %v3380_v13  ;;  %v3399_v22 = vsub.f32 %v3299_v40, %v912_v43  ;;  %v957_v25 = vmul.f32 %v3377_v10, %v3377_v10 }
 0x19d   :  { %v972_v26 = vadd.f32 %v949_v17, %v941_v30  ;;  %v953_v27 = vmul.f32 %v3383_v2, %v3383_v2  ;;  %v862_v48 = vadd.f32 %v861_v1, %v860_v53  ;;  %v869_v38 = vrot.slane %v868_v8, 4 }
 0x19e   :  { %v966_v47 = vrot.slane %v965_v9, 4  ;;  %v996_v42 = vadd.f32 %v952_v35, %v944_v5  ;;  %v961_v40 = vmul.f32 %v3392_v18, %v3392_v18  ;;  %v3409_v32 = vadd.f32 %v826_v41, %v317_v31 }
 0x19f   :  { %v973_v44 = vadd.f32 %v972_v26, %v957_v25  ;;  %v1004_v43 = vadd.f32 %v953_v27, %v945_v36  ;;  %v863_v58 = vrot.slane %v862_v48, 2  ;;  %v870_v61 = vadd.f32 %v869_v38, %v868_v8 }
 0x1a0   :  { %v967_v37 = vadd.f32 %v966_v47, %v965_v9  ;;  %v960_v28 = vmul.f32 %v3399_v22, %v3399_v22  ;;  %v3413_v55 = vadd.f32 %v832_v62, %v317_v31  ;;  %v3415_v5 = vadd.f32 %v834_v14, %v321_v6  ;;  %v840_v9 = vpop.f32.mrf.mxu1 }
 0x1a1   :  { %v974_v53 = vrot.slane %v973_v44, 4  ;;  %v1005_v33 = vadd.f32 %v1004_v43, %v961_v40  ;;  %v864_v0 = vadd.f32 %v863_v58, %v862_v48  ;;  %v871_v1 = vrot.slane %v870_v61, 2 }
 0x1a2   :  { %v968_v45 = vrot.slane %v967_v37, 2  ;;  %v997_v35 = vadd.f32 %v996_v42, %v960_v28  ;;  %v3418_v8 = vadd.f32 %v3332_v49, %v321_v6  ;;  %v3420_v25 = vadd.f32 %v838_v34, %v317_v31 }
 0x1a3   :  { %v975_v30 = vadd.f32 %v974_v53, %v973_v44  ;;  %v1006_v17 = vrot.slane %v1005_v33, 4  ;;  %v865_v47 = vrot.slane %v864_v0, 1  ;;  %v872_v36 = vadd.f32 %v871_v1, %v870_v61 }
 0x1a4   :  { %v969_v19 = vadd.f32 %v968_v45, %v967_v37  ;;  %v891_v27 = vadd.f32 %v3413_v55, %v3409_v32  ;;  %v3424_v37 = vadd.f32 %v840_v9, %v321_v6  ;;  %v899_v42 = vadd.f32 %v3415_v5, %v3418_v8 }
 0x1a5   :  { %v976_v26 = vrot.slane %v975_v30, 2  ;;  %v1007_v62 = vadd.f32 %v1006_v17, %v1005_v33  ;;  %v866_v48 = vadd.f32 %v865_v47, %v864_v0  ;;  %v873_v38 = vrot.slane %v872_v36, 1 }
 0x1a6   :  { %v970_v41 = vrot.slane %v969_v19, 1  ;;  %v892_v40 = vadd.f32 %v891_v27, %v3420_v25  ;;  %v900_v45 = vadd.f32 %v899_v42, %v3424_v37  ;;  %v998_v58 = vrot.slane %v997_v35, 4 }
 0x1a7   :  { %v977_v49 = vadd.f32 %v976_v26, %v975_v30  ;;  %v1008_v44 = vrot.slane %v1007_v62, 2  ;;  %v910_v31 = vmul.f32 0.041666668, %v866_v48  ;;  %v874_v34 = vadd.f32 %v873_v38, %v872_v36 }
 0x1a8   :  { %v971_v14 = vadd.f32 %v970_v41, %v969_v19  ;;  %v893_v41 = vrot.slane %v892_v40, 4  ;;  %v901_v47 = vrot.slane %v900_v45, 4  ;;  %v999_v36 = vadd.f32 %v998_v58, %v997_v35 }
 0x1a9   :  { %v978_v61 = vrot.slane %v977_v49, 1  ;;  %v1009_v28 = vadd.f32 %v1008_v44, %v1007_v62  ;;  %v3431_v53 = vsub.f32 %v3322_v23, %v910_v31  ;;  %v3434_v33 = vsub.f32 %v3320_v12, %v910_v31 }
 0x1aa   :  { %v1028_v43 = vmul.f32 0.041666668, %v971_v14  ;;  %v3437_v19 = vsub.f32 %v3324_v24, %v910_v31  ;;  %v911_v9 = vmul.f32 0.041666668, %v874_v34  ;;  %v902_v44 = vadd.f32 %v901_v47, %v900_v45 }
 0x1ab   :  { %v979_v0 = vadd.f32 %v978_v61, %v977_v49  ;;  %v1010_v1 = vrot.slane %v1009_v28, 1  ;;  %v942_v30 = vmul.f32 %v3431_v53, %v3431_v53  ;;  %v950_v17 = vmul.f32 %v3434_v33, %v3434_v33 }
 0x1ac   :  { %v1102_v6 = vadd.f32 1e-05, %v1028_v43  ;;  %v958_v12 = vmul.f32 %v3437_v19, %v3437_v19  ;;  %v3446_v62 = vsub.f32 %v3346_v59, %v911_v9  ;;  %v3449_v48 = vsub.f32 %v3330_v46, %v911_v9  ;;  %v3461_v59 = vld [vmem:[%s3926_s5] sm:$0xff] }
 0x1ad   :  { %v1029_v23 = vmul.f32 0.041666668, %v979_v0  ;;  %v1011_v26 = vadd.f32 %v1010_v1, %v1009_v28  ;;  %v980_v24 = vadd.f32 %v950_v17, %v942_v30  ;;  %v3452_v38 = vsub.f32 %v3348_v60, %v911_v9 }
 0x1ae   :  { %2778 = vrsqrt.f32 %v1102_v6  ;;  %v943_v35 = vmul.f32 %v3446_v62, %v3446_v62  ;;  %v894_v49 = vadd.f32 %v893_v41, %v892_v40  ;;  %v951_v43 = vmul.f32 %v3449_v48, %v3449_v48  ;;  %v3468_v40 = vld [vmem:[%s3927_s6] sm:$0xff] }
 0x1af   :  { %v1103_v27 = vadd.f32 1e-05, %v1029_v23  ;;  %v1033_v14 = vmul.f32 0.041666668, %v1011_v26  ;;  %v981_v42 = vadd.f32 %v980_v24, %v958_v12  ;;  %v903_v34 = vrot.slane %v902_v44, 2 }
 0x1b0   :  { %v895_v31 = vrot.slane %v894_v49, 2  ;;  %v1000_v60 = vrot.slane %v999_v36, 2  ;;  %v959_v58 = vmul.f32 %v3452_v38, %v3452_v38  ;;  %v988_v61 = vadd.f32 %v951_v43, %v943_v35 }
 0x1b1   :  { %2780 = vrsqrt.f32 %v1103_v27  ;;  %v982_v46 = vrot.slane %v981_v42, 4  ;;  %v1107_v45 = vadd.f32 1e-05, %v1033_v14  ;;  %v904_v0 = vadd.f32 %v903_v34, %v902_v44 }
 0x1b2   :  { %v896_v6 = vadd.f32 %v895_v31, %v894_v49  ;;  %v3472_v1 = vrot.slane %v3461_v59, %v3255_v15  ;;  %v989_v9 = vadd.f32 %v988_v61, %v959_v58  ;;  %v1045_v30 = vrot.slane %v3461_v59, %v3266_v20 }
 0x1b3   :  { %v983_v28 = vadd.f32 %v982_v46, %v981_v42  ;;  %v905_v47 = vrot.slane %v904_v0, 1  ;;  %v3478_v23 = vrot.slane %v3468_v40, %v3255_v15  ;;  %v1001_v26 = vadd.f32 %v1000_v60, %v999_v36 }
 0x1b4   :  { %v897_v41 = vrot.slane %v896_v6, 1  ;;  %v3482_v12 = vrot.slane %v3461_v59, %v3269_v21  ;;  %v990_v24 = vrot.slane %v989_v9, 4  ;;  %2782 = vrsqrt.f32 %v1107_v45 }
 0x1b5   :  { %v984_v17 = vrot.slane %v983_v28, 2  ;;  %v906_v42 = vadd.f32 %v905_v47, %v904_v0  ;;  %v1078_v35 = vmul.f32 %v3472_v1, %v3335_v50  ;;  %v1151_v44 = vrot.slane %v3468_v40, %v3266_v20 }
 0x1b6   :  { %v898_v14 = vadd.f32 %v897_v41, %v896_v6  ;;  %v991_v49 = vadd.f32 %v990_v24, %v989_v9  ;;  %v3490_v15 = vrot.slane %v3468_v40, %v3269_v21  ;;  %v1086_v36 = vmul.f32 %v3472_v1, %v3338_v51 }
 0x1b7   :  { %v985_v27 = vadd.f32 %v984_v17, %v983_v28  ;;  %v1095_v43 = vmul.f32 %v1045_v30, %v3377_v10  ;;  %v1002_v60 = vrot.slane %v1001_v26, 1  ;;  %v915_v61 = vmul.f32 0.041666668, %v906_v42 }
 0x1b8   :  { %v914_v31 = vmul.f32 0.041666668, %v898_v14  ;;  %v992_v58 = vrot.slane %v991_v49, 2  ;;  %v1079_v50 = vmul.f32 %v1045_v30, %v3370_v29 }
 0x1b9   :  { %v986_v46 = vrot.slane %v985_v27, 1  ;;  %v3506_v10 = vsub.f32 %v3418_v8, %v915_v61  ;;  %v3509_v6 = vsub.f32 %v3415_v5, %v915_v61  ;;  %v3512_v0 = vsub.f32 %v3424_v37, %v915_v61 }
 0x1ba   :  { %v3497_v20 = vsub.f32 %v3409_v32, %v914_v31  ;;  %v3500_v21 = vsub.f32 %v3413_v55, %v914_v31  ;;  %v3503_v28 = vsub.f32 %v3420_v25, %v914_v31  ;;  %v993_v51 = vadd.f32 %v992_v58, %v991_v49 }
 0x1bb   :  { %v2779_v34 = vpop.eup %2778  ;;  %v987_v45 = vadd.f32 %v986_v46, %v985_v27  ;;  %v1087_v25 = vmul.f32 %v1045_v30, %v3373_v7  ;;  %v947_v37 = vmul.f32 %v3506_v10, %v3506_v10  ;;  %v955_v27 = vmul.f32 %v3509_v6, %v3509_v6 }
 0x1bc   :  { %v946_v32 = vmul.f32 %v3497_v20, %v3497_v20  ;;  %v954_v55 = vmul.f32 %v3500_v21, %v3500_v21  ;;  %v1118_v17 = vmul.f32 %v2779_v34, %v1078_v35  ;;  %v1126_v41 = vmul.f32 %v2779_v34, %v1086_v36 }
 0x1bd   :  { %v1030_v9 = vmul.f32 0.041666668, %v987_v45  ;;  %v994_v8 = vrot.slane %v993_v51, 1  ;;  %v962_v5 = vmul.f32 %v3503_v28, %v3503_v28  ;;  %v1003_v14 = vadd.f32 %v1002_v60, %v1001_v26 }
 0x1be   :  { %v2781_v29 = vpop.eup %2780  ;;  %v1012_v24 = vadd.f32 %v954_v55, %v946_v32  ;;  %v963_v49 = vmul.f32 %v3512_v0, %v3512_v0  ;;  %v1020_v35 = vadd.f32 %v955_v27, %v947_v37  ;;  %v1184_v58 = vadd.f32 %v3478_v23, %v1118_v17 }
 0x1bf   :  { %v1104_v47 = vadd.f32 1e-05, %v1030_v9  ;;  %v995_v42 = vadd.f32 %v994_v8, %v993_v51  ;;  %v1119_v7 = vmul.f32 %v2781_v29, %v1079_v50  ;;  %v1127_v36 = vmul.f32 %v2781_v29, %v1087_v25 }
 0x1c0   :  { %v1013_v30 = vadd.f32 %v1012_v24, %v962_v5  ;;  %v1192_v61 = vadd.f32 %v3478_v23, %v1126_v41  ;;  %v1021_v9 = vadd.f32 %v1020_v35, %v963_v49  ;;  %v1135_v55 = vmul.f32 %v2781_v29, %v1095_v43  ;;  %v2743_v41 = vld [vmem:[%s3928_s7 + $0x138] sm:$0xff]  }
 0x1c1   :  { %2784 = vrsqrt.f32 %v1104_v47  ;;  %v1031_v46 = vmul.f32 0.041666668, %v995_v42  ;;  %v1185_v31 = vadd.f32 %v1151_v44, %v1119_v7  ;;  %v1193_v32 = vadd.f32 %v1151_v44, %v1127_v36  ;;  %v3529_v26 = vpop.eup %2782 }
 0x1c2   :  { %v1014_v45 = vrot.slane %v1013_v30, 4  ;;  %v1094_v60 = vmul.f32 %v3472_v1, %v3340_v52  ;;  %v1083_v51 = vmul.f32 %v3482_v12, %v3380_v13  ;;  %v1091_v25 = vmul.f32 %v3482_v12, %v3383_v2  ;;  %v2745_v52 = vld [vmem:[%s3928_s7 + $0x170] sm:$0xff]  }
 0x1c3   :  { %v1105_v50 = vadd.f32 1e-05, %v1031_v46  ;;  %v1022_v17 = vrot.slane %v1021_v9, 4  ;;  %v1209_v5 = vpack.c.bf16 %v1193_v32, %v1185_v31  ;;  %v1201_v43 = vadd.f32 %v1151_v44, %v1135_v55  ;;  %v2747_v44 = vld [vmem:[%s3928_s7 + $0x130] sm:$0xff]  }
 0x1c4   :  { %v1015_v8 = vadd.f32 %v1014_v45, %v1013_v30  ;;  %v1032_v29 = vmul.f32 0.041666668, %v1003_v14  ;;  %v1208_v47 = vpack.c.bf16 %v1192_v61, %v1184_v58  ;;  %v1134_v1 = vmul.f32 %v2779_v34, %v1094_v60  ;;  %v2749_v34 = vld [vmem:[%s3928_s7 + $0x168] sm:$0xff]  }
 0x1c5   :  { %2786 = vrsqrt.f32 %v1105_v50  ;;  %v1023_v13 = vadd.f32 %v1022_v17, %v1021_v9  ;;  %1775 = vmatprep.mubr.bf16.mxu0 %v1209_v5  ;;  %v1217_v24 = vpack.c.bf16 %v1201_v43, %v1201_v43  ;;  %v1123_v2 = vmul.f32 %v3529_v26, %v1083_v51  ;;  %v2751_v58 = vld [vmem:[%s3928_s7 + $0x128] sm:$0xff]   ;;  %v2752_v9 = vld [vmem:[%s3928_s7 + $0x160] sm:$0xff]  }
 0x1c6   :  { %v1131_v37 = vmul.f32 %v3529_v26, %v1091_v25  ;;  %1776 = vmatmul.mubr.bf16.vlgmr.msra.gmra.mxu0 %v1208_v47  ;;  %v1016_v27 = vrot.slane %v1015_v8, 2  ;;  %v1106_v14 = vadd.f32 1e-05, %v1032_v29  ;;  %v1200_v49 = vadd.f32 %v3478_v23, %v1134_v1  ;;  %v2756_v29 = vld [vmem:[%s3928_s7 + $0x158] sm:$0xff]  }
 0x1c7   :  { %v1024_v42 = vrot.slane %v1023_v13, 2  ;;  %2535 = vmatpush3.bf16.msra.mxu0 %v2743_v41  ;;  %1783 = vmatprep.mubr.bf16.mxu0 %v1217_v24  ;;  %v1049_v7 = vrot.slane %v3461_v59, %v3313_v54  ;;  %v1189_v35 = vadd.f32 %v3490_v15, %v1123_v2  ;;  %v1053_v23 = vrot.slane %v3461_v59, %v3318_v11  ;;  %v2754_v41 = vld [vmem:[%s3928_s7 + $0x120] sm:$0xff]  }
 0x1c8   :  { %2536 = vmatprep.subr.bf16.mxu0 %v2745_v52  ;;  %v1197_v36 = vadd.f32 %v3490_v15, %v1131_v37  ;;  %v1017_v46 = vadd.f32 %v1016_v27, %v1015_v8  ;;  %2788 = vrsqrt.f32 %v1106_v14  ;;  %v1216_v45 = vpack.c.bf16 %v1200_v49, %v1200_v49  ;;  %v2755_v49 = vld [vmem:[%s3928_s7 + $0x1b8] sm:$0xff]  }
 0x1c9   :  { %v1025_v30 = vadd.f32 %v1024_v42, %v1023_v13  ;;  %v1080_v32 = vmul.f32 %v1049_v7, %v3431_v53  ;;  %v1088_v55 = vmul.f32 %v1049_v7, %v3434_v33  ;;  %v1155_v51 = vrot.slane %v3468_v40, %v3313_v54  ;;  %v2760_v42 = vld [vmem:[%s3928_s7 + $0x150] sm:$0xff]  }
 0x1ca   :  { %v1213_v50 = vpack.c.bf16 %v1197_v36, %v1189_v35  ;;  %v1018_v17 = vrot.slane %v1017_v46, 1  ;;  %v1097_v53 = vmul.f32 %v1053_v23, %v3452_v38  ;;  %v1081_v33 = vmul.f32 %v1053_v23, %v3446_v62  ;;  %v2758_v62 = vld [vmem:[%s3928_s7 + $0x118] sm:$0xff]   ;;  %v2757_v36 = vld [vmem:[%s3928_s7 + $0x1f0] sm:$0xff]  }
 0x1cb   :  { %v1026_v31 = vrot.slane %v1025_v30, 1  ;;  %2537 = vmatpush3.bf16.msra.mxu0 %v2747_v44  ;;  %v1089_v43 = vmul.f32 %v1053_v23, %v3449_v48  ;;  %v1159_v54 = vrot.slane %v3468_v40, %v3318_v11  ;;  %v1096_v44 = vmul.f32 %v1049_v7, %v3437_v19  ;;  %v2762_v19 = vld [vmem:[%s3928_s7 + $0x110] sm:$0xff]  }
 0x1cc   :  { %2538 = vmatprep.subr.bf16.mxu0 %v2749_v34  ;;  %v1019_v2 = vadd.f32 %v1018_v17, %v1017_v46  ;;  %v1057_v14 = vrot.slane %v3461_v59, %v3258_v16  ;;  %v2768_v17 = vld [vmem:[%s3928_s7 + $0x140] sm:$0xff]  }
 0x1cd   :  { %v1027_v60 = vadd.f32 %v1026_v31, %v1025_v30  ;;  %v2764_v31 = vld [vmem:[%s3928_s7 + $0x148] sm:$0xff]  }
 0x1ce   :  { %v2785_v61 = vpop.eup %2784  ;;  %1784 = vmatmul.mubr.bf16.gmra.mxu0 %v1216_v45  ;;  %v1034_v30 = vmul.f32 0.041666668, %v1019_v2  ;;  %v1082_v23 = vmul.f32 %v1057_v14, %v3344_v57  ;;  %v1090_v45 = vmul.f32 %v1057_v14, %v3355_v39  ;;  %v2766_v57 = vld [vmem:[%s3928_s7 + $0x108] sm:$0xff]   ;;  %v1163_v39 = vrot.slane %v3468_v40, %v3258_v16 }
 0x1cf   :  { %v1120_v25 = vmul.f32 %v2785_v61, %v1080_v32  ;;  %v1128_v8 = vmul.f32 %v2785_v61, %v1088_v55  ;;  %v1035_v5 = vmul.f32 0.041666668, %v1027_v60  ;;  %2539 = vmatpush3.bf16.msra.mxu0 %v2751_v58  ;;  %1871 = vmatprep.mubr.bf16.mxu0 %v1213_v50  ;;  %v1136_v46 = vmul.f32 %v2785_v61, %v1096_v44  ;;  %v2759_v61 = vld [vmem:[%s3928_s7 + $0x1b0] sm:$0xff]   ;;  %v2761_v55 = vld [vmem:[%s3928_s7 + $0x1e8] sm:$0xff]  }
 0x1d0   :  { %2540 = vmatprep.subr.bf16.mxu0 %v2752_v9  ;;  %v1108_v9 = vadd.f32 1e-05, %v1034_v30  ;;  %v1069_v32 = vrot.slane %v3461_v59, %v3365_v4  ;;  %v1171_v30 = vrot.slane %v3468_v40, %v3360_v63 }
 0x1d1   :  { %v1109_v52 = vadd.f32 1e-05, %v1035_v5  ;;  %v1186_v38 = vadd.f32 %v1155_v51, %v1120_v25  ;;  %v1194_v37 = vadd.f32 %v1155_v51, %v1128_v8  ;;  %v1202_v60 = vadd.f32 %v1155_v51, %v1136_v46  ;;  %v2763_v51 = vld [vmem:[%s3928_s7 + $0x1a8] sm:$0xff]  }
 0x1d2   :  { %v2787_v47 = vpop.eup %2786  ;;  %v1099_v8 = vmul.f32 %v3482_v12, %v3392_v18  ;;  %v1175_v5 = vrot.slane %v3468_v40, %v3365_v4  ;;  %v2765_v18 = vld [vmem:[%s3928_s7 + $0x1e0] sm:$0xff]   ;;  %v1085_v12 = vmul.f32 %v1069_v32, %v3506_v10 }
 0x1d3   :  { %v1121_v1 = vmul.f32 %v2787_v47, %v1081_v33  ;;  %v1129_v13 = vmul.f32 %v2787_v47, %v1089_v43  ;;  %v1137_v24 = vmul.f32 %v2787_v47, %v1097_v53  ;;  %2790 = vrsqrt.f32 %v1109_v52  ;;  %2541 = vmatpush3.bf16.msra.mxu0 %v2754_v41  ;;  %v2770_v33 = vld [vmem:[%s3928_s7 + $0x100] sm:$0xff]  }
 0x1d4   :  { %2542 = vmatprep.subr.bf16.mxu0 %v2756_v29  ;;  %v1210_v35 = vpack.c.bf16 %v1194_v37, %v1186_v38  ;;  %v1139_v16 = vmul.f32 %v3529_v26, %v1099_v8  ;;  %2792 = vrsqrt.f32 %v1108_v9  ;;  %v1218_v41 = vpack.c.bf16 %v1202_v60, %v1202_v60  ;;  %v2767_v10 = vld [vmem:[%s3928_s7 + $0x1a0] sm:$0xff]   ;;  %v1974_v9 = vld [vmem:[%s3930_s9 + $0x78] sm:$0xff]  ;;  %v1968_v8 = vld [vmem:[%s3930_s9 + $0x48] sm:$0xff] }
 0x1d5   :  { %v1187_v11 = vadd.f32 %v1159_v54, %v1121_v1  ;;  %v1195_v48 = vadd.f32 %v1159_v54, %v1129_v13  ;;  %v1203_v27 = vadd.f32 %v1159_v54, %v1137_v24  ;;  %v2789_v58 = vpop.eup %2788  ;;  %v1093_v53 = vmul.f32 %v1069_v32, %v3509_v6  ;;  %v2769_v13 = vld [vmem:[%s3928_s7 + $0x1d8] sm:$0xff]  }
 0x1d6   :  { %v1122_v50 = vmul.f32 %v2789_v58, %v1082_v23  ;;  %v1130_v25 = vmul.f32 %v2789_v58, %v1090_v45  ;;  %v1098_v47 = vmul.f32 %v1057_v14, %v3399_v22  ;;  %v1205_v6 = vadd.f32 %v3490_v15, %v1139_v16  ;;  %v2771_v22 = vld [vmem:[%s3928_s7 + $0x198] sm:$0xff]   ;;  %v2772_v15 = vld [vmem:[%s3928_s7 + $0x1d0] sm:$0xff]  }
 0x1d7   :  { %v1211_v34 = vpack.c.bf16 %v1195_v48, %v1187_v11  ;;  %2543 = vmatpush3.bf16.msra.mxu0 %v2758_v62  ;;  %v1219_v7 = vpack.c.bf16 %v1203_v27, %v1203_v27  ;;  %v1065_v11 = vrot.slane %v3461_v59, %v3360_v63  ;;  %v2773_v48 = vld [vmem:[%s3928_s7 + $0x190] sm:$0xff]   ;;  %v2774_v27 = vld [vmem:[%s3928_s7 + $0x1c8] sm:$0xff]  }
 0x1d8   :  { %2544 = vmatprep.subr.bf16.mxu0 %v2760_v42  ;;  %v1188_v4 = vadd.f32 %v1163_v39, %v1122_v50  ;;  %v1196_v26 = vadd.f32 %v1163_v39, %v1130_v25  ;;  %v1138_v2 = vmul.f32 %v2789_v58, %v1098_v47  ;;  %v1221_v37 = vpack.c.bf16 %v1205_v6, %v1205_v6  ;;  %v2775_v59 = vld [vmem:[%s3928_s7 + $0x188] sm:$0xff]   ;;  %v1967_v25 = vld [vmem:[%s3930_s9 + $0x40] sm:$0xff] }
 0x1d9   :  { %1823 = vmatprep.mubr.bf16.mxu1 %v1211_v34  ;;  %v1084_v14 = vmul.f32 %v1065_v11, %v3497_v20  ;;  %v1092_v34 = vmul.f32 %v1065_v11, %v3500_v21  ;;  %v2776_v20 = vld [vmem:[%s3928_s7 + $0x1c0] sm:$0xff]  }
 0x1da   :  { %1824 = vmatmul.mubr.bf16.vlgmr.msra.gmra.mxu1 %v1210_v35  ;;  %v1212_v24 = vpack.c.bf16 %v1196_v26, %v1188_v4  ;;  %v1204_v62 = vadd.f32 %v1163_v39, %v1138_v2  ;;  %v2777_v21 = vld [vmem:[%s3928_s7 + $0x180] sm:$0xff]   ;;  %v1970_v39 = vld [vmem:[%s3930_s9 + $0x58] sm:$0xff]  ;;  %v1960_v26 = vld [vmem:[%s3930_s9 + $0x8] sm:$0xff] }
 0x1db   :  { %2563 = vmatpush3.bf16.msra.mxu1 %v2755_v49  ;;  %1831 = vmatprep.mubr.bf16.mxu1 %v1219_v7  ;;  %v1101_v49 = vmul.f32 %v1069_v32, %v3512_v0  ;;  %v1959_v4 = vld [vmem:[%s3930_s9] sm:$0xff] }
 0x1dc   :  { %2564 = vmatprep.subr.bf16.mxu1 %v2757_v36  ;;  %2545 = vmatpush3.bf16.msra.mxu0 %v2762_v19  ;;  %v1220_v44 = vpack.c.bf16 %v1204_v62, %v1204_v62 }
 0x1dd   :  { %2546 = vmatprep.subr.bf16.mxu0 %v2764_v31  ;;  %v1100_v31 = vmul.f32 %v1065_v11, %v3503_v28  ;;  %v1971_v28 = vld [vmem:[%s3930_s9 + $0x60] sm:$0xff] }
 0x1df   :  { %2565 = vmatpush3.bf16.msra.mxu1 %v2759_v61  ;;  %v1973_v61 = vld [vmem:[%s3930_s9 + $0x70] sm:$0xff] }
 0x1e0   :  { %2566 = vmatprep.subr.bf16.mxu1 %v2761_v55  ;;  %2547 = vmatpush3.bf16.msra.mxu0 %v2766_v57  ;;  %v2791_v43 = vpop.eup %2790  ;;  %v3681_v32 = vpack.c.bf16 %v1974_v9, %v1973_v61  ;;  %v1972_v55 = vld [vmem:[%s3930_s9 + $0x68] sm:$0xff]  ;;  %v1969_v57 = vld [vmem:[%s3930_s9 + $0x50] sm:$0xff] }
 0x1e1   :  { %2548 = vmatprep.subr.bf16.mxu0 %v2768_v17  ;;  %v1125_v54 = vmul.f32 %v2791_v43, %v1085_v12  ;;  %v1133_v29 = vmul.f32 %v2791_v43, %v1093_v53  ;;  %v2793_v42 = vpop.eup %2792  ;;  %v1141_v46 = vmul.f32 %v2791_v43, %v1101_v49  ;;  %v3686_v60 = vpack.c.bf16 %v1972_v55, %v1971_v28  ;;  %v1961_v53 = vld [vmem:[%s3930_s9 + $0x10] sm:$0xff] }
 0x1e2   :  { %1832 = vmatmul.mubr.bf16.gmra.mxu1 %v1218_v41  ;;  %v1124_v35 = vmul.f32 %v2793_v42, %v1084_v14  ;;  %v1132_v36 = vmul.f32 %v2793_v42, %v1092_v34  ;;  %v1140_v40 = vmul.f32 %v2793_v42, %v1100_v31  ;;  %v3699_v50 = vpack.c.bf16 %v1970_v39, %v1969_v57  ;;  %v1963_v41 = vld [vmem:[%s3930_s9 + $0x20] sm:$0xff] }
 0x1e3   :  { %2567 = vmatpush3.bf16.msra.mxu1 %v2763_v51  ;;  %v1191_v52 = vadd.f32 %v1175_v5, %v1125_v54  ;;  %v1199_v1 = vadd.f32 %v1175_v5, %v1133_v29  ;;  %v1207_v7 = vadd.f32 %v1175_v5, %v1141_v46  ;;  %v3711_v17 = vpack.c.bf16 %v1968_v8, %v1967_v25  ;;  %v1965_v51 = vld [vmem:[%s3930_s9 + $0x30] sm:$0xff]  ;;  %v1966_v5 = vld [vmem:[%s3930_s9 + $0x38] sm:$0xff] }
 0x1e4   :  { %2568 = vmatprep.subr.bf16.mxu1 %v2765_v18  ;;  %2549 = vmatpush3.bf16.msra.mxu0 %v2770_v33  ;;  %v1190_v0 = vadd.f32 %v1171_v30, %v1124_v35  ;;  %v1198_v19 = vadd.f32 %v1171_v30, %v1132_v36  ;;  %v1206_v23 = vadd.f32 %v1171_v30, %v1140_v40  ;;  %v1964_v18 = vld [vmem:[%s3930_s9 + $0x28] sm:$0xff]  ;;  %v1962_v33 = vld [vmem:[%s3930_s9 + $0x18] sm:$0xff]  ;;  %v2409_v36 = vld [vmem:[%s3929_s8] ss:$0 sm:$0xff] }
 0x1e5   :  { %v1215_v38 = vpack.c.bf16 %v1199_v1, %v1191_v52  ;;  %v1223_v58 = vpack.c.bf16 %v1207_v7, %v1207_v7  ;;  %2618 = vmatprep.subr.bf16.mxu0 %v3681_v32  ;;  %v3726_v16 = vpack.c.bf16 %v1966_v5, %v1965_v51  ;;  %v3738_v12 = vpack.c.bf16 %v1964_v18, %v1963_v41 }
 0x1e6   :  { %v1214_v63 = vpack.c.bf16 %v1198_v19, %v1190_v0  ;;  %v1222_v45 = vpack.c.bf16 %v1206_v23, %v1206_v23  ;;  %v3750_v43 = vpack.c.bf16 %v1962_v33, %v1961_v53  ;;  %v3762_v54 = vpack.c.bf16 %v1960_v26, %v1959_v4 }
 0x1e7   :  { %2569 = vmatpush3.bf16.msra.mxu1 %v2767_v10  ;;  %1872 = vmatmul.mubr.bf16.vlgmr.msra.gmra.mxu0 %v1212_v24 }
 0x1e8   :  { %1919 = vmatprep.mubr.bf16.mxu1 %v1215_v38  ;;  %2570 = vmatprep.subr.bf16.mxu1 %v2769_v13 }
 0x1e9   :  { %1879 = vmatprep.mubr.bf16.mxu0 %v1221_v37  ;;  %2619 = vmatpush3.bf16.msra.mxu0 %v3681_v32 }
 0x1ea   :  { %2620 = vmatprep.subr.bf16.mxu0 %v3686_v60 }
 0x1eb   :  { %2571 = vmatpush3.bf16.msra.mxu1 %v2771_v22 }
 0x1ec   :  { %2572 = vmatprep.subr.bf16.mxu1 %v2772_v15 }
 0x1ed   :  { %2621 = vmatpush3.bf16.msra.mxu0 %v3686_v60 }
 0x1ee   :  { %2622 = vmatprep.subr.bf16.mxu0 %v3699_v50 }
 0x1ef   :  { %2573 = vmatpush3.bf16.msra.mxu1 %v2773_v48  ;;  %1880 = vmatmul.mubr.bf16.gmra.mxu0 %v1220_v44 }
 0x1f0   :  { %2574 = vmatprep.subr.bf16.mxu1 %v2774_v27 }
 0x1f1   :  { %2623 = vmatpush3.bf16.msra.mxu0 %v3699_v50 }
 0x1f2   :  { %2624 = vmatprep.subr.bf16.mxu0 %v3711_v17 }
 0x1f3   :  { %2575 = vmatpush3.bf16.msra.mxu1 %v2775_v59 }
 0x1f4   :  { %2576 = vmatprep.subr.bf16.mxu1 %v2776_v20 }
 0x1f5   :  { %2625 = vmatpush3.bf16.msra.mxu0 %v3711_v17 }
 0x1f6   :  { %2626 = vmatprep.subr.bf16.mxu0 %v3726_v16 }
 0x1f7   :  { %2577 = vmatpush3.bf16.msra.mxu1 %v2777_v21 }
 0x1f8   :  { %2638 = vmatprep.subr.bf16.mxu1 %v2848_v56 }
 0x1f9   :  { %2627 = vmatpush3.bf16.msra.mxu0 %v3726_v16 }
 0x1fa   :  { %1920 = vmatmul.mubr.bf16.vlgmr.msra.gmra.mxu1 %v1214_v63  ;;  %2628 = vmatprep.subr.bf16.mxu0 %v3738_v12 }
 0x1fb   :  { %1927 = vmatprep.mubr.bf16.mxu1 %v1223_v58  ;;  %2639 = vmatpush3.bf16.msra.mxu1 %v3681_v32 }
 0x1fc   :  { %2640 = vmatprep.subr.bf16.mxu1 %v2848_v56 }
 0x1fd   :  { %2629 = vmatpush3.bf16.msra.mxu0 %v3738_v12 }
 0x1fe   :  { %2630 = vmatprep.subr.bf16.mxu0 %v3750_v43 }
 0x1ff   :  { %2641 = vmatpush3.bf16.msra.mxu1 %v3686_v60 }
 0x200   :  { %2642 = vmatprep.subr.bf16.mxu1 %v2848_v56 }
 0x201   :  { %2631 = vmatpush3.bf16.msra.mxu0 %v3750_v43 }
 0x202   :  { %1928 = vmatmul.mubr.bf16.gmra.mxu1 %v1222_v45  ;;  %2632 = vmatprep.subr.bf16.mxu0 %v3762_v54 }
 0x203   :  { %2643 = vmatpush3.bf16.msra.mxu1 %v3699_v50  ;;  %2654 = vmatprep.mubr.msk.bf16.mxu1 %vm2849_vm9, %v2848_v56 }
 0x204   :  { %2644 = vmatprep.subr.bf16.mxu1 %v2848_v56 }
 0x205   :  { %2633 = vmatpush3.bf16.msra.mxu0 %v3762_v54 }
 0x206   :  { %2658 = vmatprep.subr.bf16.mxu0 %v2848_v56 }
 0x207   :  { %2645 = vmatpush3.bf16.msra.mxu1 %v3711_v17 }
 0x208   :  { %2646 = vmatprep.subr.bf16.mxu1 %v2848_v56 }
 0x20b   :  { %2647 = vmatpush3.bf16.msra.mxu1 %v3726_v16 }
 0x20c   :  { %2648 = vmatprep.subr.bf16.mxu1 %v2848_v56 }
 0x20f   :  { %2649 = vmatpush3.bf16.msra.mxu1 %v3738_v12 }
 0x210   :  { %2650 = vmatprep.subr.bf16.mxu1 %v2848_v56 }
 0x213   :  { %2651 = vmatpush3.bf16.msra.mxu1 %v3750_v43 }
 0x214   :  { %2652 = vmatprep.subr.bf16.mxu1 %v2848_v56 }
 0x217   :  { %2653 = vmatpush3.bf16.msra.mxu1 %v3762_v54 }
 0x286   :  { %v2494_v29 = vpop.f32.mrf.mxu0 }
 0x288   :  { %v2495_v47 = vpop.f32.mrf.mxu0 }
 0x289   :  { %v2496_v30 = vadd.f32 %v2495_v47, %v2494_v29 }
 0x28a   :  { %v2497_v10 = vpop.f32.mrf.mxu0 }
 0x28b   :  { %v1778_v21 = vadd.f32 %v2496_v30, %v2409_v36 }
 0x28c   :  { %v2498_v6 = vpop.f32.mrf.mxu0 }
 0x28d   :  { %v2499_v46 = vadd.f32 %v2498_v6, %v2497_v10 }
 0x28e   :  { %v2500_v52 = vpop.f32.mrf.mxu0 }
 0x28f   :  { %v1781_v63 = vadd.f32 %v2499_v46, %v2409_v36 }
 0x290   :  { %v2501_v1 = vpop.f32.mrf.mxu0 }
 0x291   :  { %v2502_v58 = vadd.f32 %v2501_v1, %v2500_v52 }
 0x292   :  { %v2503_v13 = vpop.f32.mrf.mxu0 }
 0x293   :  { %v1786_v25 = vadd.f32 %v2502_v58, %v2409_v36 }
 0x294   :  { %v2504_v24 = vpop.f32.mrf.mxu0 }
 0x29a   :  { %v2522_v2 = vpop.f32.mrf.mxu1 }
 0x29c   :  { %v2523_v38 = vpop.f32.mrf.mxu1 }
 0x29d   :  { %v2524_v20 = vadd.f32 %v2523_v38, %v2522_v2 }
 0x29e   :  { %v2525_v22 = vpop.f32.mrf.mxu1 }
 0x29f   :  { %v1826_v7 = vadd.f32 %v2524_v20, %v1778_v21 }
 0x2a0   :  { %v2526_v37 = vpop.f32.mrf.mxu1 }
 0x2a1   :  { %v2527_v31 = vadd.f32 %v2526_v37, %v2525_v22 }
 0x2a2   :  { %v2528_v15 = vpop.f32.mrf.mxu1 }
 0x2a3   :  { %v1829_v28 = vadd.f32 %v2527_v31, %v1781_v63  ;;  %v2850_v63 = vmov 0  }
 0x2a4   :  { %v2529_v62 = vpop.f32.mrf.mxu1  ;;  %2684 = vset.pattern.permute.xlu1 %v2850_v63  ;;  %2685 = vset.pattern.permute.xlu0 %v2850_v63 }
 0x2a5   :  { %v2530_v55 = vadd.f32 %v2529_v62, %v2528_v15 }
 0x2a6   :  { %v2531_v11 = vpop.f32.mrf.mxu1 }
 0x2a7   :  { %v2550_v48 = vpop.f32.mrf.mxu0  ;;  %v1834_v18 = vadd.f32 %v2530_v55, %v1786_v25 }
 0x2a8   :  { %v2532_v27 = vpop.f32.mrf.mxu1 }
 0x2a9   :  { %v2551_v42 = vpop.f32.mrf.mxu0 }
 0x2aa   :  { %v2552_v0 = vadd.f32 %v2551_v42, %v2550_v48 }
 0x2ab   :  { %v2553_v44 = vpop.f32.mrf.mxu0 }
 0x2ac   :  { %v1874_v23 = vadd.f32 %v2552_v0, %v1826_v7 }
 0x2ad   :  { %v2554_v14 = vpop.f32.mrf.mxu0 }
 0x2ae   :  { %v2555_v45 = vadd.f32 %v2554_v14, %v2553_v44 }
 0x2af   :  { %v2556_v34 = vpop.f32.mrf.mxu0 }
 0x2b0   :  { %v1877_v8 = vadd.f32 %v2555_v45, %v1829_v28 }
 0x2b1   :  { %v2557_v49 = vpop.f32.mrf.mxu0 }
 0x2b2   :  { %v2558_v51 = vadd.f32 %v2557_v49, %v2556_v34 }
 0x2b3   :  { %v2559_v59 = vpop.f32.mrf.mxu0 }
 0x2b4   :  { %v1882_v4 = vadd.f32 %v2558_v51, %v1834_v18 }
 0x2b5   :  { %v2560_v35 = vpop.f32.mrf.mxu0 }
 0x2ba   :  { %v2578_v19 = vpop.f32.mrf.mxu1 }
 0x2bc   :  { %v2579_v40 = vpop.f32.mrf.mxu1 }
 0x2bd   :  { %v2580_v61 = vadd.f32 %v2579_v40, %v2578_v19 }
 0x2be   :  { %v2581_v9 = vpop.f32.mrf.mxu1 }
 0x2bf   :  { %v3773_v57 = vadd.f32 %v2580_v61, %v1874_v23 }
 0x2c0   :  { %v2582_v39 = vpop.f32.mrf.mxu1 }
 0x2c1   :  { %1935 = vst [vmem:[#allocation3] sm:$0xff] %v3773_v57  ;;  %v2583_v5 = vadd.f32 %v2582_v39, %v2581_v9 }
 0x2c2   :  { %v2584_v41 = vpop.f32.mrf.mxu1 }
 0x2c3   :  { %v3776_v53 = vadd.f32 %v2583_v5, %v1877_v8 }
 0x2c4   :  { %v2585_v33 = vpop.f32.mrf.mxu1 }
 0x2c5   :  { %1936 = vst [vmem:[#allocation3 + $0x8] sm:$0xff] %v3776_v53  ;;  %v2586_v26 = vadd.f32 %v2585_v33, %v2584_v41  ;;  %v1984_v29 = vpack.c.bf16 %v3776_v53, %v3773_v57 }
 0x2c6   :  { %v2587_v47 = vpop.f32.mrf.mxu1 }
 0x2c7   :  { %v3781_v10 = vadd.f32 %v2586_v26, %v1882_v4  ;;  %2634 = vmatprep.mubr.bf16.mxu0 %v1984_v29 }
 0x2c8   :  { %v2588_v6 = vpop.f32.mrf.mxu1 }
 0x2c9   :  { %1937 = vst [vmem:[#allocation3 + $0x10] sm:$0xff] %v3781_v10  ;;  %v1985_v52 = vpack.c.bf16 %v3781_v10, %v3781_v10  ;;  %v1940_v6 = vld [vmem:[%s3923_s2 + $0x10] sm:$0xff] }
 0x2cb   :  { %2635 = vmatmul.mubr.bf16.vlgmr.msra.gmra.mxu0 %v1985_v52  ;;  %2655 = vmatmul.mubr.bf16.vlgmr.msra.gmra.mxu1 %v1985_v52 }
 0x2cc   :  { %2659 = vmatpush3.bf16.msra.mxu0 %v3681_v32  ;;  %2674 = vmatprep.mubr.msk.bf16.mxu0 %vm2849_vm9, %v2848_v56  ;;  %v2109_v32 = vadd.f32 %v3781_v10, %v3773_v57 }
 0x2cd   :  { %2660 = vmatprep.subr.bf16.mxu0 %v2848_v56 }
 0x2d0   :  { %2661 = vmatpush3.bf16.msra.mxu0 %v3686_v60  ;;  %v3804_v60 = vmul.f32 0.5, %v2109_v32 }
 0x2d1   :  { %2662 = vmatprep.subr.bf16.mxu0 %v2848_v56 }
 0x2d4   :  { %2663 = vmatpush3.bf16.msra.mxu0 %v3699_v50  ;;  %v2151_v50 = vpack.c.bf16 %v3804_v60, %v3804_v60 }
 0x2d5   :  { %2664 = vmatprep.subr.bf16.mxu0 %v2848_v56 }
 0x2d8   :  { %2665 = vmatpush3.bf16.msra.mxu0 %v3711_v17  ;;  %v2477_v17 = vld [vmem:[%s3931_s10] ss:$0 sm:$0xff] }
 0x2d9   :  { %2666 = vmatprep.subr.bf16.mxu0 %v2848_v56 }
 0x2dc   :  { %2667 = vmatpush3.bf16.msra.mxu0 %v3726_v16 }
 0x2dd   :  { %2668 = vmatprep.subr.bf16.mxu0 %v2848_v56 }
 0x2e0   :  { %2669 = vmatpush3.bf16.msra.mxu0 %v3738_v12 }
 0x2e1   :  { %2670 = vmatprep.subr.bf16.mxu0 %v2848_v56 }
 0x2e4   :  { %2671 = vmatpush3.bf16.msra.mxu0 %v3750_v43 }
 0x2e5   :  { %2672 = vmatprep.subr.bf16.mxu0 %v2848_v56 }
 0x2e8   :  { %2673 = vmatpush3.bf16.msra.mxu0 %v3762_v54 }
 0x2eb   :  { %2675 = vmatmul.mubr.bf16.vlgmr.msra.gmra.mxu0 %v2151_v50 }
 0x38b   :  { %v2636_v16 = vpop.f32.mrf.mxu0  ;;  %v2145_v12 = vpop.f32.mrf.mxu1 }
 0x38c   :  { %v3812_v1 = vadd.f32 %v2636_v16, %v2477_v17  ;;  %v2192_v13 = vadd.f32 %v2477_v17, %v2145_v12  ;;  %v2203_v11 = vmul.f32 0.4, %v2145_v12  ;;  %v2196_v48 = vmul.f32 0.2, %v2145_v12 }
 0x38d   :  { %v2026_v43 = vpop.f32.mrf.mxu0  ;;  %v2656_v24 = vpop.f32.mrf.mxu1  ;;  %v2217_v30 = vmul.f32 0.8, %v2145_v12  ;;  %v2210_v35 = vmul.f32 0.6, %v2145_v12 }
 0x38e   :  { %v3814_v2 = vadd.f32 %v2477_v17, %v2026_v43  ;;  %2221 = vmax.xlane.f32.xlu0 %v2192_v13 }
 0x38f   :  { %v2637_v38 = vpop.f32.mrf.mxu0  ;;  %v2148_v54 = vpop.f32.mrf.mxu1 }
 0x391   :  { %v2029_v22 = vpop.f32.mrf.mxu0  ;;  %v2657_v37 = vpop.f32.mrf.mxu1 }
 0x392   :  { %v3816_v15 = vadd.f32 %v2477_v17, %v2029_v22 }
 0x3ab   :  { %v2186_v62 = vpop.f32.mrf.mxu0 }
 0x3ac   :  { %v2204_v27 = vmul.f32 0.6, %v2186_v62  ;;  %v2197_v42 = vmul.f32 0.8, %v2186_v62  ;;  %v2218_v44 = vmul.f32 0.2, %v2186_v62 }
 0x3ad   :  { %v2676_v14 = vpop.f32.mrf.mxu0  ;;  %v2211_v34 = vmul.f32 0.4, %v2186_v62 }
 0x3ae   :  { %v2205_v49 = vadd.f32 %v2204_v27, %v2203_v11  ;;  %v2198_v59 = vadd.f32 %v2197_v42, %v2196_v48  ;;  %v2219_v21 = vadd.f32 %v2218_v44, %v2217_v30 }
 0x3af   :  { %v2189_v36 = vpop.f32.mrf.mxu0  ;;  %v2212_v0 = vadd.f32 %v2211_v34, %v2210_v35 }
 0x3b0   :  { %v2206_v20 = vadd.f32 %v2477_v17, %v2205_v49  ;;  %v2199_v46 = vadd.f32 %v2477_v17, %v2198_v59  ;;  %v2220_v7 = vadd.f32 %v2477_v17, %v2219_v21 }
 0x3b1   :  { %v2677_v19 = vpop.f32.mrf.mxu0  ;;  %v2213_v31 = vadd.f32 %v2477_v17, %v2212_v0 }
 0x3b2   :  { %2249 = vmax.xlane.f32.xlu0 %v2206_v20  ;;  %2235 = vmax.xlane.f32.xlu1 %v2199_v46 }
 0x3b6   :  { %2277 = vmax.xlane.f32.xlu0 %v2220_v7  ;;  %2263 = vmax.xlane.f32.xlu1 %v2213_v31 }
 0x417   :  { %v2222_v40 = vpop.xlane.xlu0 %2221 }
 0x418   :  { %v3820_v58 = vsub.f32 %v2192_v13, %v2222_v40 }
 0x41a   :  { %v2224_v23 = vmul.f32 1.442695, %v3820_v58 }
 0x41c   :  { %2794 = vpow2.f32 %v2224_v23 }
 0x429   :  { %v2795_v45 = vpop.eup %2794 }
 0x42a   :  { %2226 = vadd.xlane.f32.xlu1 %v2795_v45 }
 0x43b   :  { %v2250_v61 = vpop.xlane.xlu0 %2249  ;;  %v2236_v9 = vpop.xlane.xlu1 %2235 }
 0x43c   :  { %v3823_v28 = vsub.f32 %v2206_v20, %v2250_v61  ;;  %v3825_v55 = vsub.f32 %v2199_v46, %v2236_v9  ;;  %v1938_v61 = vld [vmem:[%s3923_s2] sm:$0xff]  ;;  %v2091_v9 = vsub.f32 %v3773_v57, %v3776_v53 }
 0x43e   :  { %v2252_v39 = vmul.f32 1.442695, %v3823_v28  ;;  %v2238_v25 = vmul.f32 1.442695, %v3825_v55 }
 0x43f   :  { %v2278_v8 = vpop.xlane.xlu0 %2277  ;;  %v2264_v51 = vpop.xlane.xlu1 %2263 }
 0x440   :  { %2796 = vpow2.f32 %v2252_v39  ;;  %v3829_v5 = vsub.f32 %v2220_v7, %v2278_v8  ;;  %v3831_v41 = vsub.f32 %v2213_v31, %v2264_v51  ;;  %v1939_v31 = vld [vmem:[%s3923_s2 + $0x8] sm:$0xff]  ;;  %s2851_s2 = smov [#allocation3]  }
 0x441   :  { %2798 = vpow2.f32 %v2238_v25  ;;  %s2374_s18 = sshll.u32 %s2851_s2, 4  ;;  %s2375_s18 = int_to_ptr.vmem [resolvable:$true] %s2374_s18 }
 0x442   :  { %v2266_v18 = vmul.f32 1.442695, %v3831_v41  ;;  %v2280_v33 = vmul.f32 1.442695, %v3829_v5  ;;  %s2826_s19 = scalar_lea.vmem %s2375_s18, 384  ;;  %p2831_p1 = scmp.lt.s32.totalorder %s2375_s18, %s2375_s18 }
 0x443   :  { %p2827_p0 = scmp.ne.s32.totalorder %s2375_s18, %s2826_s19  ;;  %p2832_p2 = scmp.lt.s32.totalorder %s2826_s19, %s2826_s19 }
 0x444   :  { %2800 = vpow2.f32 %v2266_v18 }
 0x445   :  { %2802 = vpow2.f32 %v2280_v33  ;;  %p2833_p3 = por %p2832_p2, %p2831_p1 }
 0x447   :  { %p2834_p4 = pnand %p2833_p3, %p2827_p0 }
 0x44d   :  { %v2797_v4 = vpop.eup %2796 }
 0x44e   :  { %v2799_v26 = vpop.eup %2798  ;;  %2254 = vadd.xlane.f32.xlu1 %v2797_v4 }
 0x44f   :  { %2240 = vadd.xlane.f32.xlu0 %v2799_v26 }
 0x451   :  { %v2801_v29 = vpop.eup %2800 }
 0x452   :  { %2042 = vmax.xlane.f32.xlu1 %v3816_v15  ;;  %v2803_v47 = vpop.eup %2802 }
 0x453   :  { %2268 = vadd.xlane.f32.xlu0 %v2801_v29 }
 0x456   :  { %2282 = vadd.xlane.f32.xlu1 %v2803_v47 }
 0x457   :  { %2040 = vmax.xlane.f32.xlu0 %v3814_v2 }
 0x45b   :  { %2044 = vmax.xlane.f32.xlu0 %v3812_v1 }
 0x467   :  { %1948 = vperm.xlu1 %2684, %v1940_v6  }
 0x4b3   :  { %v2227_v52 = vpop.xlane.xlu1 %2226 }
 0x4d7   :  { %v2255_v32 = vpop.xlane.xlu1 %2254 }
 0x4d8   :  { %v2241_v50 = vpop.xlane.xlu0 %2240 }
 0x4db   :  { %v2043_v17 = vpop.xlane.xlu1 %2042 }
 0x4dc   :  { %v2269_v16 = vpop.xlane.xlu0 %2268  ;;  %v3842_v12 = vsub.f32 %v3816_v15, %v2043_v17 }
 0x4de   :  { %v2051_v13 = vmul.f32 1.442695, %v3842_v12 }
 0x4df   :  { %v2283_v15 = vpop.xlane.xlu1 %2282 }
 0x4e0   :  { %2804 = vpow2.f32 %v2051_v13  ;;  %v2041_v43 = vpop.xlane.xlu0 %2040 }
 0x4e1   :  { %v3846_v24 = vsub.f32 %v3814_v2, %v2041_v43  ;;  %2806 = vlog2.f32 %v2227_v52 }
 0x4e2   :  { %2808 = vlog2.f32 %v2241_v50 }
 0x4e3   :  { %v2049_v38 = vmul.f32 1.442695, %v3846_v24  ;;  %v1949_v2 = vpop.permute.xlu1 %1948 }
 0x4e4   :  { %v2045_v54 = vpop.xlane.xlu0 %2044  ;;  %vm1952_vm10 = vcmp.eq.s32.totalorder %v3061_v3, %v1949_v2 }
 0x4e5   :  { %2810 = vpow2.f32 %v2049_v38  ;;  %v3850_v22 = vsub.f32 %v3812_v1, %v2045_v54  ;;  %v3855_v34 = vsel %vm1952_vm10, 1.0, %v2848_v56 }
 0x4e6   :  { %2812 = vlog2.f32 %v2255_v32 }
 0x4e7   :  { %v2053_v37 = vmul.f32 1.442695, %v3850_v22 }
 0x4e9   :  { %2814 = vpow2.f32 %v2053_v37 }
 0x4ea   :  { %2816 = vlog2.f32 %v2269_v16 }
 0x4eb   :  { %2818 = vlog2.f32 %v2283_v15  ;;  %v2193_v15 = vmul.f32 0.2, %v3781_v10 }
 0x4ed   :  { %v2805_v62 = vpop.eup %2804 }
 0x4ee   :  { %2057 = vadd.xlane.f32.xlu0 %v2805_v62  ;;  %v2807_v11 = vpop.eup %2806  ;;  %v2194_v62 = vmul.f32 0.8, %v3804_v60 }
 0x4ef   :  { %v2809_v48 = vpop.eup %2808  ;;  %v2229_v42 = vmul.f32 0.6931472, %v2807_v11  ;;  %v2201_v11 = vmul.f32 0.6, %v3804_v60 }
 0x4f0   :  { %v2243_v1 = vmul.f32 0.6931472, %v2809_v48 }
 0x4f1   :  { %v2230_v49 = vsub.f32 %v3820_v58, %v2229_v42 }
 0x4f2   :  { %v2811_v27 = vpop.eup %2810  ;;  %v2244_v35 = vsub.f32 %v3825_v55, %v2243_v1  ;;  %v2095_v55 = vsub.f32 %v3773_v57, %v3781_v10 }
 0x4f3   :  { %2055 = vadd.xlane.f32.xlu1 %v2811_v27  ;;  %v2813_v44 = vpop.eup %2812  ;;  %v2231_v30 = vmul.f32 %v3855_v34, %v2230_v49  ;;  %v2208_v27 = vmul.f32 0.4, %v3804_v60  ;;  %v2215_v49 = vmul.f32 0.2, %v3804_v60 }
 0x4f4   :  { %v2257_v59 = vmul.f32 0.6931472, %v2813_v44  ;;  %v2245_v46 = vmul.f32 %v3855_v34, %v2244_v35  ;;  %v2096_v39 = vmul.f32 %v2095_v55, %v2095_v55  ;;  %v2200_v35 = vmul.f32 0.4, %v3781_v10 }
 0x4f6   :  { %v2815_v14 = vpop.eup %2814  ;;  %v2258_v21 = vsub.f32 %v3823_v28, %v2257_v59  ;;  %v2092_v28 = vmul.f32 %v2091_v9, %v2091_v9 }
 0x4f7   :  { %2059 = vadd.xlane.f32.xlu0 %v2815_v14  ;;  %v2817_v36 = vpop.eup %2816 }
 0x4f8   :  { %v2271_v20 = vmul.f32 0.6931472, %v2817_v36  ;;  %v2819_v0 = vpop.eup %2818  ;;  %v2259_v7 = vmul.f32 %v3855_v34, %v2258_v21  ;;  %v2195_v36 = vadd.f32 %v2194_v62, %v2193_v15 }
 0x4f9   :  { %v2285_v19 = vmul.f32 0.6931472, %v2819_v0 }
 0x4fa   :  { %v2272_v40 = vsub.f32 %v3831_v41, %v2271_v20  ;;  %v2207_v20 = vmul.f32 0.6, %v3781_v10 }
 0x4fb   :  { %2232 = vadd.xlane.f32.xlu0 %v2231_v30  ;;  %v2286_v23 = vsub.f32 %v3829_v5, %v2285_v19  ;;  %v2202_v19 = vadd.f32 %v2201_v11, %v2200_v35 }
 0x4fc   :  { %v2273_v58 = vmul.f32 %v3855_v34, %v2272_v40 }
 0x4fd   :  { %v2287_v45 = vmul.f32 %v3855_v34, %v2286_v23 }
 0x4ff   :  { %2246 = vadd.xlane.f32.xlu0 %v2245_v46  ;;  %v2214_v46 = vmul.f32 0.8, %v3781_v10 }
 0x501   :  { %v2216_v60 = vadd.f32 %v2215_v49, %v2214_v46 }
 0x503   :  { %2260 = vadd.xlane.f32.xlu0 %v2259_v7 }
 0x504   :  { %1945 = vperm.xlu1 %2684, %v1939_v31   ;;  %v2209_v31 = vadd.f32 %v2208_v27, %v2207_v20 }
 0x507   :  { %2274 = vadd.xlane.f32.xlu0 %v2273_v58 }
 0x50b   :  { %2288 = vadd.xlane.f32.xlu0 %v2287_v45 }
 0x521   :  { %1942 = vperm.xlu0 %2685, %v1938_v61  }
 0x528   :  { %2093 = vadd.xlane.f32.xlu1 %v2092_v28 }
 0x540   :  { %2097 = vadd.xlane.f32.xlu0 %v2096_v39 }
 0x577   :  { %v2058_v25 = vpop.xlane.xlu0 %2057 }
 0x57c   :  { %v2056_v41 = vpop.xlane.xlu1 %2055 }
 0x57d   :  { %2820 = vlog2.f32 %v2056_v41 }
 0x580   :  { %v2060_v8 = vpop.xlane.xlu0 %2059  ;;  %v1946_v28 = vpop.permute.xlu1 %1945 }
 0x581   :  { %2822 = vlog2.f32 %v2060_v8  ;;  %vm1951_vm9 = vcmp.eq.s32.totalorder %v3061_v3, %v1946_v28 }
 0x582   :  { %2824 = vlog2.f32 %v2058_v25 }
 0x584   :  { %v2233_v51 = vpop.xlane.xlu0 %2232 }
 0x585   :  { %v2234_v5 = vsub.f32 0.0, %v2233_v51 }
 0x587   :  { %vm2302_vm11 = vcmp.le.f32.partialorder %v2234_v5, 0.1 }
 0x588   :  { %v2247_v18 = vpop.xlane.xlu0 %2246  ;;  %v2303_v53 = vsel %vm2302_vm11, %v2234_v5, 0.0 }
 0x589   :  { %v2248_v33 = vsub.f32 0.0, %v2247_v18 }
 0x58a   :  { %v2821_v37 = vpop.eup %2820 }
 0x58b   :  { %v2291_v4 = vadd.f32 %v2248_v33, %v2234_v5  ;;  %vm2304_vm12 = vcmp.le.f32.partialorder %v2248_v33, 0.1  ;;  %v2062_v59 = vmul.f32 0.6931472, %v2821_v37  ;;  %v2475_v5 = vsel %vm1951_vm9, 1.0, %v2848_v56 }
 0x58c   :  { %v2305_v26 = vsel %vm2304_vm12, %v2248_v33, 0.0  ;;  %v2261_v29 = vpop.xlane.xlu0 %2260 }
 0x58d   :  { %vm2312_vm13 = vcmp.gt.f32.partialorder %v2305_v26, %v2303_v53  ;;  %v2262_v47 = vsub.f32 0.0, %v2261_v29  ;;  %v2067_v58 = vsub.f32 %v3846_v24, %v2062_v59 }
 0x58e   :  { %v2313_v52 = vsel %vm2312_vm13, %v2305_v26, %v2303_v53  ;;  %v2314_v2 = vsel %vm2312_vm13, 1, %v2850_v63  ;;  %v2823_v42 = vpop.eup %2822 }
 0x58f   :  { %v2292_v6 = vadd.f32 %v2291_v4, %v2262_v47  ;;  %vm2306_vm14 = vcmp.le.f32.partialorder %v2262_v47, 0.1  ;;  %v2825_v21 = vpop.eup %2824  ;;  %v2066_v0 = vmul.f32 0.6931472, %v2823_v42 }
 0x590   :  { %v2307_v32 = vsel %vm2306_vm14, %v2262_v47, 0.0  ;;  %v2275_v50 = vpop.xlane.xlu0 %2274  ;;  %v2064_v45 = vmul.f32 0.6931472, %v2825_v21 }
 0x591   :  { %vm2315_vm15 = vcmp.gt.f32.partialorder %v2307_v32, %v2313_v52  ;;  %v2276_v17 = vsub.f32 0.0, %v2275_v50  ;;  %v2069_v25 = vsub.f32 %v3850_v22, %v2066_v0 }
 0x592   :  { %v2316_v13 = vsel %vm2315_vm15, %v2307_v32, %v2313_v52  ;;  %v2317_v44 = vsel %vm2315_vm15, 2, %v2314_v2  ;;  %v2068_v24 = vsub.f32 %v3842_v12, %v2064_v45 }
 0x593   :  { %v2293_v16 = vadd.f32 %v2292_v6, %v2276_v17  ;;  %vm2308_vm0 = vcmp.le.f32.partialorder %v2276_v17, 0.1  ;;  %v2072_v51 = vmul.f32 %v3855_v34, %v2069_v25 }
 0x594   :  { %v2309_v43 = vsel %vm2308_vm0, %v2276_v17, 0.0  ;;  %v2289_v38 = vpop.xlane.xlu0 %2288  ;;  %v2071_v41 = vmul.f32 %v2475_v5, %v2068_v24 }
 0x595   :  { %vm2318_vm1 = vcmp.gt.f32.partialorder %v2309_v43, %v2316_v13  ;;  %v2290_v54 = vsub.f32 0.0, %v2289_v38 }
 0x596   :  { %v2319_v1 = vsel %vm2318_vm1, %v2309_v43, %v2316_v13  ;;  %v2320_v30 = vsel %vm2318_vm1, 3, %v2317_v44 }
 0x597   :  { %v3884_v48 = vadd.f32 %v2293_v16, %v2290_v54  ;;  %vm2310_vm2 = vcmp.le.f32.partialorder %v2290_v54, 0.1 }
 0x598   :  { %v2311_v14 = vsel %vm2310_vm2, %v2290_v54, 0.0 }
 0x599   :  { %vm2321_vm3 = vcmp.gt.f32.partialorder %v2311_v14, %v2319_v1 }
 0x59a   :  { %v2322_v63 = vsel %vm2321_vm3, 4, %v2320_v30 }
 0x59b   :  { %vm2323_vm4 = vcmp.eq.s32.totalorder %v2322_v63, 1  ;;  %vm2327_vm5 = vcmp.eq.s32.totalorder %v2322_v63, 2  ;;  %vm2331_vm7 = vcmp.eq.s32.totalorder %v2322_v63, 3  ;;  %vm2335_vm8 = vcmp.eq.s32.totalorder %v2322_v63, 4 }
 0x59c   :  { %v1943_v7 = vpop.permute.xlu0 %1942  ;;  %v2326_v40 = vsel %vm2323_vm4, %v2195_v36, %v3781_v10 }
 0x59d   :  { %vm1950_vm6 = vcmp.eq.s32.totalorder %v3061_v3, %v1943_v7  ;;  %v2330_v23 = vsel %vm2327_vm5, %v2202_v19, %v2326_v40 }
 0x59e   :  { %v2474_v61 = vsel %vm1950_vm6, 1.0, %v2848_v56  ;;  %v2334_v9 = vsel %vm2331_vm7, %v2209_v31, %v2330_v23 }
 0x59f   :  { %v2070_v55 = vmul.f32 %v2474_v61, %v2067_v58  ;;  %v2338_v39 = vsel %vm2335_vm8, %v2216_v60, %v2334_v9 }
 0x5a0   :  { %v2339_v8 = vsub.f32 %v3773_v57, %v2338_v39 }
 0x5a1   :  { %2073 = vadd.xlane.f32.xlu0 %v2070_v55 }
 0x5a2   :  { %v2340_v10 = vmul.f32 %v2339_v8, %v2339_v8 }
 0x5a4   :  { %2341 = vadd.xlane.f32.xlu1 %v2340_v10 }
 0x5a5   :  { %2077 = vadd.xlane.f32.xlu0 %v2072_v51 }
 0x5a8   :  { %2075 = vadd.xlane.f32.xlu1 %v2071_v41 }
 0x5a9   :  { %2837 = shalt.err (!%p2834_p4)
}
 0x5aa   :  { %s2852_s20 = smov 128   ;;  %s2853_s21 = smov 8   ;;  %v2295_v53 = vrot.slane %v3884_v48, 4  ;;  %v2354_v20 = vstv %s3921_s0  ;;  %vm2360_vm10 = vcmp.eq.s32.totalorder %v3061_v3, 0  ;;  %vm2362_vm11 = vcmp.eq.s32.totalorder %v3061_v3, 1 }
 0x5ab   :  { %2380 = dma.vmem_to_hbm [thread:$0]  %s2375_s18, 384, %s3932_s11, [#allocation4], %s2852_s20, %s2852_s20, %s2853_s21   ;;  %vm2365_vm12 = vcmp.eq.s32.totalorder %v3061_v3, 2 }
 0x5ac   :  { %v2296_v6 = vadd.f32 %v2295_v53, %v3884_v48  ;;  %s2356_s24 = ssub.f32 1.0, %s3921_s0 }
 0x5ae   :  { %v2297_v38 = vrot.slane %v2296_v6, 2  ;;  %v2357_v46 = vstv %s2356_s24 }
 0x5b0   :  { %v2298_v27 = vadd.f32 %v2297_v38, %v2296_v6 }
 0x5b1   :  { %v2094_v57 = vpop.xlane.xlu1 %2093 }
 0x5b2   :  { %v2299_v49 = vrot.slane %v2298_v27, 1 }
 0x5b4   :  { %v2300_v21 = vadd.f32 %v2299_v49, %v2298_v27 }
 0x5b6   :  { %v2301_v40 = vmul.f32 0.025, %v2300_v21 }
 0x5b8   :  { %v2366_v28 = vsel %vm2365_vm12, %v2301_v40, 0.0 }
 0x5c9   :  { %v2098_v56 = vpop.xlane.xlu0 %2097 }
 0x5ca   :  { %v2099_v12 = vsub.f32 %v2094_v57, %v2098_v56 }
 0x5cc   :  { %v2100_v22 = vadd.f32 1.0, %v2099_v12 }
 0x5ce   :  { %v2101_v34 = vmax.f32 %v2100_v22, 0.0 }
 0x5d0   :  { %v2102_v18 = vrot.slane %v2101_v34, 4 }
 0x5d2   :  { %v2103_v33 = vadd.f32 %v2102_v18, %v2101_v34 }
 0x5d4   :  { %v2104_v29 = vrot.slane %v2103_v33, 2 }
 0x5d6   :  { %v2105_v17 = vadd.f32 %v2104_v29, %v2103_v33 }
 0x5d8   :  { %v2106_v62 = vrot.slane %v2105_v17, 1 }
 0x5da   :  { %v2107_v1 = vadd.f32 %v2106_v62, %v2105_v17 }
 0x5dc   :  { %v2108_v35 = vmul.f32 0.125, %v2107_v1 }
 0x5de   :  { %v2355_v7 = vmul.f32 %v2354_v20, %v2108_v35 }
 0x62a   :  { %v2074_v4 = vpop.xlane.xlu0 %2073 }
 0x62b   :  { %v2079_v16 = vsub.f32 0.0, %v2074_v4 }
 0x62d   :  { %v2342_v26 = vpop.xlane.xlu1 %2341 }
 0x62e   :  { %v2343_v47 = vsub.f32 %v2094_v57, %v2342_v26  ;;  %v2078_v32 = vpop.xlane.xlu0 %2077 }
 0x62f   :  { %v2081_v37 = vsub.f32 0.0, %v2078_v32 }
 0x630   :  { %v2344_v52 = vadd.f32 1.0, %v2343_v47 }
 0x631   :  { %v2076_v50 = vpop.xlane.xlu1 %2075 }
 0x632   :  { %v2345_v13 = vmax.f32 %v2344_v52, 0.0  ;;  %v2080_v43 = vsub.f32 0.0, %v2076_v50 }
 0x634   :  { %v2346_v54 = vrot.slane %v2345_v13, 4  ;;  %v2082_v15 = vadd.f32 %v2080_v43, %v2079_v16 }
 0x636   :  { %v2347_v11 = vadd.f32 %v2346_v54, %v2345_v13  ;;  %v2083_v2 = vadd.f32 %v2082_v15, %v2081_v37 }
 0x638   :  { %v2348_v42 = vrot.slane %v2347_v11, 2  ;;  %v2084_v44 = vrot.slane %v2083_v2, 4 }
 0x63a   :  { %v2349_v14 = vadd.f32 %v2348_v42, %v2347_v11  ;;  %v2085_v48 = vadd.f32 %v2084_v44, %v2083_v2 }
 0x63c   :  { %v2350_v59 = vrot.slane %v2349_v14, 1  ;;  %v2086_v30 = vrot.slane %v2085_v48, 2 }
 0x63e   :  { %v2351_v63 = vadd.f32 %v2350_v59, %v2349_v14  ;;  %v2087_v36 = vadd.f32 %v2086_v30, %v2085_v48 }
 0x640   :  { %v2352_v0 = vmul.f32 0.125, %v2351_v63  ;;  %v2088_v19 = vrot.slane %v2087_v36, 1 }
 0x642   :  { %v2358_v31 = vmul.f32 %v2357_v46, %v2352_v0  ;;  %v2089_v60 = vadd.f32 %v2088_v19, %v2087_v36 }
 0x644   :  { %v2359_v58 = vadd.f32 %v2358_v31, %v2355_v7  ;;  %v2090_v23 = vmul.f32 0.041666668, %v2089_v60 }
 0x646   :  { %v2361_v45 = vsel %vm2360_vm10, %v2359_v58, 0.0  ;;  %v2363_v61 = vsel %vm2362_vm11, %v2090_v23, 0.0 }
 0x647   :  { %v2364_v9 = vadd.f32 %v2363_v61, %v2361_v45 }
 0x649   :  { %v2367_v55 = vadd.f32 %v2366_v28, %v2364_v9 }
 0x64b   :  { %2368 = vst [vmem:[%s3933_s12] sm:$0x1] %v2367_v55 }
 0x64c   :  { %2846 = dma.done.wait [#allocation4], 384  }
 0x64d   :  { %2847 = vsyncadd [#allocation4], 4294966912 }
 0x64e   :  { %2388 = vsyncpa [#allocation4], 1 }

</bundles_post_ra>
